<compile_context>
chip_gen: v5e
topology: v5e:2x2
jax: 0.10.0
libtpu: 0.0.40
codegen_flags: <defaults>
</compile_context>

<pallas_src>
import functools
import itertools

import numpy as np
import jax
import jax.numpy as jnp
from jax import lax
from jax.experimental import pallas as pl
from jax.experimental.pallas import tpu as pltpu


_PARAM_NAMES = ("w1", "b1", "w2", "b2")


# ----------------------------------------------------------------------------
# In-kernel batched encoder body (single invocation, no per-sample grid)
# ----------------------------------------------------------------------------

def _encode_batch(x_ref, w1, b1, w2, b2, pooled_ref, out_ref, *,
                  n, inv_p, normalize):
    """Encode the first `n` samples of x_ref into out_ref.

    x_ref      : (B, C, P) f32 VMEM ref (P = H*W on the 128-lane axis)
    w1         : (hidden, C) f32      b1 : (hidden, 1) f32
    w2         : (hidden, dim) f32    b2 : (1, dim) f32
    pooled_ref : (n, hidden) f32 VMEM scratch
    out_ref    : (n, dim) f32 VMEM ref (written once, lane-dense)
    """
    # bf16 only for MXU operands; cast happens once per call (not per grid
    # step).  All elementwise math stays f32 (v5e has no bf16 VPU/EUP).
    w1b = w1.astype(jnp.bfloat16)
    for b in range(n):                                   # static unroll, n small
        xb = x_ref[b].astype(jnp.bfloat16)               # (C, P)
        # 1x1 conv as (hidden, C) @ (C, P): lane-dense along P, f32 accumulate.
        # NOTE: contraction depth C is tiny; a VPU broadcast-FMA variant may
        # win on v5e/v6e -- keep on the MXU until a bundle dump says otherwise.
        h = jnp.dot(w1b, xb, preferred_element_type=jnp.float32)   # (hidden, P)
        h = jnp.maximum(h + b1, 0.0)                                # ReLU
        # Global average pool == lane reduction into one row of the scratch.
        pooled_ref[b, :] = jnp.sum(h, axis=1) * inv_p
    pooled = pooled_ref[...]                              # (n, hidden)
    # fc as one real MXU matmul + a single lane-dense (n, dim) store.
    out = jnp.dot(pooled, w2, preferred_element_type=jnp.float32) + b2
    if normalize:
        # F.normalize(dim=1): x * rsqrt(max(||x||^2, eps^2)); rsqrt -> EUP.
        nrm2 = jnp.sum(out * out, axis=-1, keepdims=True)
        out = out * lax.rsqrt(jnp.maximum(nrm2, 1e-24))
    out_ref[...] = out.astype(out_ref.dtype)


# ----------------------------------------------------------------------------
# Pallas kernels
# ----------------------------------------------------------------------------

def _encoder_q_kernel(x_ref, w1_ref, b1_ref, w2_ref, b2_ref, out_ref, pooled,
                      *, inv_p, normalize):
    _encode_batch(x_ref, w1_ref[...], b1_ref[...], w2_ref[...], b2_ref[...],
                  pooled, out_ref, n=x_ref.shape[0], inv_p=inv_p,
                  normalize=normalize)


def _fused_qk_kernel(x_ref, w1q_ref, b1q_ref, w2q_ref, b2q_ref,
                     w1k_ref, b1k_ref, w2k_ref, b2k_ref,
                     q_ref, k_ref, w1o_ref, b1o_ref, w2o_ref, b2o_ref,
                     pooled_q, pooled_k, *, m, inv_p, normalize, n_k):
    """Fused single-step pass over the first crop group:
      1. momentum update  param_k <- m*param_k + (1-m)*param_q   (written once,
         aliased onto the old key-param buffers, stays VMEM-resident)
      2. query-encoder forward on all samples  -> q_ref (B, dim)
      3. key-encoder forward with the blended params on the first n_k samples
         -> k_ref (n_k, dim)
    Matches the PyTorch order: update, then key forward.  There is no grid, so
    the blended params are trivially visible to both forwards.
    """
    w1o_ref[...] = w1k_ref[...] * m + w1q_ref[...] * (1.0 - m)
    b1o_ref[...] = b1k_ref[...] * m + b1q_ref[...] * (1.0 - m)
    w2o_ref[...] = w2k_ref[...] * m + w2q_ref[...] * (1.0 - m)
    b2o_ref[...] = b2k_ref[...] * m + b2q_ref[...] * (1.0 - m)

    _encode_batch(x_ref, w1q_ref[...], b1q_ref[...], w2q_ref[...], b2q_ref[...],
                  pooled_q, q_ref, n=x_ref.shape[0], inv_p=inv_p,
                  normalize=normalize)
    _encode_batch(x_ref, w1o_ref[...], b1o_ref[...], w2o_ref[...], b2o_ref[...],
                  pooled_k, k_ref, n=n_k, inv_p=inv_p, normalize=normalize)


def _enqueue_kernel(ptr_ref, kn_ref, q_in_ref, q_out_ref, sem):
    """queue[half, ptr:ptr+bs, :] = keys[half]  (queue aliased in/out, HBM).

    Only the ptr window moves over DMA; the rest of the (potentially huge)
    queue never enters VMEM.
    """
    del q_in_ref          # same HBM buffer as q_out_ref (aliased); content kept
    p = ptr_ref[0]
    bs = kn_ref.shape[1]
    copies = []
    for half in range(2):                                   # static unroll
        cp = pltpu.make_async_copy(
            kn_ref.at[half],                                # (bs, dim) in VMEM
            q_out_ref.at[half, pl.ds(p, bs), :],            # contiguous HBM slab
            sem.at[half])
        cp.start()
        copies.append(cp)
    for cp in copies:
        cp.wait()


# ----------------------------------------------------------------------------
# Wrappers around pallas_call
# ----------------------------------------------------------------------------

_VMEM = pl.BlockSpec(memory_space=pltpu.MemorySpace.VMEM)
_SMEM = pl.BlockSpec(memory_space=pltpu.MemorySpace.SMEM)
_HBM = pl.BlockSpec(memory_space=pl.ANY)


def encoder_q_forward(params, x_nchw, *, normalize):
    """Query encoder on an NCHW batch -> (B, dim); one kernel invocation."""
    B, C, H, W = x_nchw.shape
    P = H * W
    x = x_nchw.reshape(B, C, P)                 # free reshape, no transpose
    w1, b1, w2, b2 = (params[n] for n in _PARAM_NAMES)
    hidden, dim = w2.shape
    return pl.pallas_call(
        functools.partial(_encoder_q_kernel, inv_p=1.0 / P, normalize=normalize),
        in_specs=[_VMEM] * 5,
        out_specs=_VMEM,
        out_shape=jax.ShapeDtypeStruct((B, dim), jnp.float32),
        scratch_shapes=[pltpu.VMEM((B, hidden), jnp.float32)],
    )(x, w1, b1, w2, b2)


def fused_qk_forward(params_q, params_k, x_nchw, *, n_k, m, normalize):
    """Fused: q forward on the whole group, momentum update, k forward on the
    first n_k samples.  Returns (q, k, new_params_k)."""
    B, C, H, W = x_nchw.shape
    P = H * W
    x = x_nchw.reshape(B, C, P)
    pq = [params_q[n] for n in _PARAM_NAMES]
    pk = [params_k[n] for n in _PARAM_NAMES]
    hidden, dim = params_q["w2"].shape

    out_shape = ([jax.ShapeDtypeStruct((B, dim), jnp.float32),
                  jax.ShapeDtypeStruct((n_k, dim), jnp.float32)]
                 + [jax.ShapeDtypeStruct(p.shape, p.dtype) for p in pk])

    results = pl.pallas_call(
        functools.partial(_fused_qk_kernel, m=m, inv_p=1.0 / P,
                          normalize=normalize, n_k=n_k),
        in_specs=[_VMEM] * 9,
        out_specs=[_VMEM] * 6,
        out_shape=out_shape,
        scratch_shapes=[pltpu.VMEM((B, hidden), jnp.float32),
                        pltpu.VMEM((n_k, hidden), jnp.float32)],
        # blended key params overwrite the old key-param buffers
        input_output_aliases={5: 2, 6: 3, 7: 4, 8: 5},
    )(x, *pq, *pk)

    q = results[0]
    k = results[1]
    new_params_k = dict(zip(_PARAM_NAMES, results[2:]))
    return q, k, new_params_k


def dequeue_and_enqueue(queue, queue_ptr, kn):
    """Ring-buffer enqueue: queue[h, ptr:ptr+bs, :] = keys of half h.

    Queue stays HBM-resident; only the 2*bs*dim window is transferred."""
    two_bs, dim = kn.shape
    bs = two_bs // 2
    K = queue.shape[1]
    assert K % bs == 0              # ring never wraps mid-write (as in PyTorch)
    kn3 = kn.reshape(2, bs, dim)    # rows [:bs] -> half 0, rows [bs:] -> half 1
    new_queue = pl.pallas_call(
        _enqueue_kernel,
        in_specs=[_SMEM,            # ptr
                  _VMEM,            # new keys
                  _HBM],            # queue (never DMA'd in full)
        out_specs=_HBM,
        out_shape=jax.ShapeDtypeStruct(queue.shape, queue.dtype),
        scratch_shapes=[pltpu.SemaphoreType.DMA((2,))],
        input_output_aliases={2: 0},                     # queue updated in place
        compiler_params=pltpu.CompilerParams(has_side_effects=True),
    )(queue_ptr, kn3, queue)
    new_ptr = ((queue_ptr + bs) % K).astype(jnp.int32)
    return new_queue, new_ptr


# ----------------------------------------------------------------------------
# MoCoM model (parameters, queue, forward)
# ----------------------------------------------------------------------------

def init_encoder_params(key, in_ch, hidden, dim):
    k1, k2 = jax.random.split(key)
    return {
        "w1": 0.1 * jax.random.normal(k1, (hidden, in_ch), jnp.float32),
        "b1": jnp.zeros((hidden, 1), jnp.float32),
        "w2": 0.1 * jax.random.normal(k2, (hidden, dim), jnp.float32),
        "b2": jnp.zeros((1, dim), jnp.float32),
    }


def init_moco(key, in_ch=4, hidden=32, dim=128, K=256):
    kp, kq = jax.random.split(key)
    params_q = init_encoder_params(kp, in_ch, hidden, dim)
    # key encoder initialized as a copy of the query encoder (as in __init__)
    params_k = jax.tree_util.tree_map(lambda p: p.copy(), params_q)
    # Queue stored as (2, K, dim): dim=128 on the lane axis, enqueue writes a
    # contiguous (bs, dim) slab.  The module-facing view is (2, dim, K).
    queue = jax.random.normal(kq, (2, K, dim), jnp.float32)
    queue = queue / jnp.linalg.norm(queue, axis=2, keepdims=True)
    queue_ptr = jnp.zeros((1,), jnp.int32)
    return params_q, params_k, queue, queue_ptr


def _crop_group_ends(resolutions):
    # torch.cumsum(torch.unique_consecutive(res, return_counts=True)[1], 0)
    counts = [len(list(g)) for _, g in itertools.groupby(resolutions)]
    return list(np.cumsum(counts))


def moco_forward(params_q, params_k, queue, queue_ptr, inputs,
                 m=0.999, eval_mode=False):
    """Returns (q, k, queue_old) and the updated state (params_k, queue, ptr)."""
    if not isinstance(inputs, (list, tuple)):
        inputs = [inputs]
    idx_crops = _crop_group_ends([int(inp.shape[-1]) for inp in inputs])
    bs = inputs[0].shape[0]
    normalize = not eval_mode      # forward_head L2-normalize fused into epilogue

    q_parts = []
    k = None
    start_idx = 0
    for end_idx in idx_crops:
        img = jnp.concatenate(inputs[start_idx:end_idx], axis=0)
        if start_idx == 0:
            # TODO(synk): DDP batch shuffle (concat_all_gather + broadcast) has
            # no single-device equivalent; the encoder has no batch statistics,
            # so shuffle . encode . unshuffle == encode and it is skipped.
            n_k = min(bs * 2, img.shape[0])
            q0, k, params_k = fused_qk_forward(
                params_q, params_k, img, n_k=n_k, m=m, normalize=normalize)
            q_parts.append(q0)
        else:
            q_parts.append(encoder_q_forward(params_q, img, normalize=normalize))
        start_idx = end_idx

    q = q_parts[0] if len(q_parts) == 1 else jnp.concatenate(q_parts, axis=0)

    if eval_mode:
        return q, (params_k, queue, queue_ptr)

    # ---- forward_head ----  (q, k already L2-normalized in-kernel)
    queue_old = jnp.swapaxes(queue, 1, 2)       # module-facing (2, dim, K) clone
    new_queue, new_ptr = dequeue_and_enqueue(queue, queue_ptr, k)
    return (q, k, queue_old), (params_k, new_queue, new_ptr)


# ----------------------------------------------------------------------------
# Demo
# ----------------------------------------------------------------------------

if __name__ == "__main__":
    dim, K, m = 128, 256, 0.999
    bs, C, hidden = 2, 4, 32

    root = jax.random.PRNGKey(0)
    k_init, k_x1, k_x2, k_x3 = jax.random.split(root, 4)

    params_q, params_k, queue, queue_ptr = init_moco(
        k_init, in_ch=C, hidden=hidden, dim=dim, K=K)
    queue_before = queue

    # multi-crop NCHW inputs: two global 16x16 crops + one local 8x8 crop
    x1 = jax.random.normal(k_x1, (bs, C, 16, 16), jnp.float32)
    x2 = jax.random.normal(k_x2, (bs, C, 16, 16), jnp.float32)
    x3 = jax.random.normal(k_x3, (bs, C, 8, 8), jnp.float32)
    inputs = [x1, x2, x3]

    (q, k, queue_old), (params_k, queue, queue_ptr) = moco_forward(
        params_q, params_k, queue, queue_ptr, inputs, m=m)

    jax.block_until_ready((q, k, queue_old, queue, queue_ptr, params_k["w1"]))

    assert q.shape == (3 * bs, dim)
    assert k.shape == (2 * bs, dim)
    assert queue_old.shape == (2, dim, K)            # module-facing clone view
    assert bool(jnp.all(jnp.isfinite(q))) and bool(jnp.all(jnp.isfinite(k)))
    # q and k rows are unit-norm after the fused normalize epilogue
    assert bool(jnp.allclose(jnp.linalg.norm(q, axis=1), 1.0, atol=1e-3))
    assert bool(jnp.allclose(jnp.linalg.norm(k, axis=1), 1.0, atol=1e-3))
    # params_k == params_q initially, so the momentum blend leaves them (almost)
    # equal, and the fused k forward matches the q forward on the shared crops
    assert bool(jnp.allclose(params_k["w1"], params_q["w1"], atol=1e-5))
    assert bool(jnp.allclose(k, q[: 2 * bs], atol=5e-2))
    # returned queue "clone" is the pre-update queue
    assert bool(jnp.allclose(queue_old, jnp.swapaxes(queue_before, 1, 2)))
    # enqueue wrote keys into rows ptr:ptr+bs of each half, rest untouched
    assert bool(jnp.allclose(queue[0, :bs, :], k[:bs], atol=1e-6))
    assert bool(jnp.allclose(queue[1, :bs, :], k[bs:], atol=1e-6))
    assert bool(jnp.allclose(queue[:, bs:, :], queue_before[:, bs:, :]))
    assert int(queue_ptr[0]) == bs

    print("KERNEL_OK")
</pallas_src>

<mosaic_0001>
module attributes {stable_mosaic.version = 11 : i64} {
  func.func @_fused_qk_kernel(%arg0: memref<4x4x256xf32, #tpu.memory_space<vmem>>, %arg1: memref<32x4xf32, #tpu.memory_space<vmem>>, %arg2: memref<32x1xf32, #tpu.memory_space<vmem>>, %arg3: memref<32x128xf32, #tpu.memory_space<vmem>>, %arg4: memref<1x128xf32, #tpu.memory_space<vmem>>, %arg5: memref<32x4xf32, #tpu.memory_space<vmem>>, %arg6: memref<32x1xf32, #tpu.memory_space<vmem>>, %arg7: memref<32x128xf32, #tpu.memory_space<vmem>>, %arg8: memref<1x128xf32, #tpu.memory_space<vmem>>, %arg9: memref<4x128xf32, #tpu.memory_space<vmem>>, %arg10: memref<4x128xf32, #tpu.memory_space<vmem>>, %arg11: memref<32x4xf32, #tpu.memory_space<vmem>>, %arg12: memref<32x1xf32, #tpu.memory_space<vmem>>, %arg13: memref<32x128xf32, #tpu.memory_space<vmem>>, %arg14: memref<1x128xf32, #tpu.memory_space<vmem>>, %arg15: memref<4x32xf32, #tpu.memory_space<vmem>>, %arg16: memref<4x32xf32, #tpu.memory_space<vmem>>) attributes {dimension_semantics = [], scalar_prefetch = 0 : i64, scratch_operands = 2 : i64, tpu.core_type = #tpu.core_type<tc>} {
    %c0 = arith.constant 0 : index
    %c0_0 = arith.constant 0 : index
    %0 = vector.load %arg5[%c0, %c0_0] : memref<32x4xf32, #tpu.memory_space<vmem>>, vector<32x4xf32>
    %cst = arith.constant 9.990000e-01 : f32
    %1 = vector.broadcast %cst : f32 to vector<32x4xf32>
    %2 = arith.mulf %0, %1 : vector<32x4xf32>
    %c0_1 = arith.constant 0 : index
    %c0_2 = arith.constant 0 : index
    %3 = vector.load %arg1[%c0_1, %c0_2] : memref<32x4xf32, #tpu.memory_space<vmem>>, vector<32x4xf32>
    %cst_3 = arith.constant 1.000000e-03 : f32
    %4 = vector.broadcast %cst_3 : f32 to vector<32x4xf32>
    %5 = arith.mulf %3, %4 : vector<32x4xf32>
    %6 = arith.addf %2, %5 : vector<32x4xf32>
    %c0_4 = arith.constant 0 : index
    %c0_5 = arith.constant 0 : index
    %7 = vector.load %arg11[%c0_4, %c0_5] : memref<32x4xf32, #tpu.memory_space<vmem>>, vector<32x4xf32>
    tpu.vector_store %arg11[%c0_4, %c0_5], %6 {strides = array<i32>} : memref<32x4xf32, #tpu.memory_space<vmem>>, vector<32x4xf32>,
    %c0_6 = arith.constant 0 : index
    %c0_7 = arith.constant 0 : index
    %8 = vector.load %arg6[%c0_6, %c0_7] : memref<32x1xf32, #tpu.memory_space<vmem>>, vector<32x1xf32>
    %cst_8 = arith.constant 9.990000e-01 : f32
    %9 = vector.broadcast %cst_8 : f32 to vector<32x1xf32>
    %10 = arith.mulf %8, %9 : vector<32x1xf32>
    %c0_9 = arith.constant 0 : index
    %c0_10 = arith.constant 0 : index
    %11 = vector.load %arg2[%c0_9, %c0_10] : memref<32x1xf32, #tpu.memory_space<vmem>>, vector<32x1xf32>
    %cst_11 = arith.constant 1.000000e-03 : f32
    %12 = vector.broadcast %cst_11 : f32 to vector<32x1xf32>
    %13 = arith.mulf %11, %12 : vector<32x1xf32>
    %14 = arith.addf %10, %13 : vector<32x1xf32>
    %c0_12 = arith.constant 0 : index
    %c0_13 = arith.constant 0 : index
    %15 = vector.load %arg12[%c0_12, %c0_13] : memref<32x1xf32, #tpu.memory_space<vmem>>, vector<32x1xf32>
    tpu.vector_store %arg12[%c0_12, %c0_13], %14 {strides = array<i32>} : memref<32x1xf32, #tpu.memory_space<vmem>>, vector<32x1xf32>,
    %c0_14 = arith.constant 0 : index
    %c0_15 = arith.constant 0 : index
    %16 = vector.load %arg7[%c0_14, %c0_15] : memref<32x128xf32, #tpu.memory_space<vmem>>, vector<32x128xf32>
    %cst_16 = arith.constant 9.990000e-01 : f32
    %17 = vector.broadcast %cst_16 : f32 to vector<32x128xf32>
    %18 = arith.mulf %16, %17 : vector<32x128xf32>
    %c0_17 = arith.constant 0 : index
    %c0_18 = arith.constant 0 : index
    %19 = vector.load %arg3[%c0_17, %c0_18] : memref<32x128xf32, #tpu.memory_space<vmem>>, vector<32x128xf32>
    %cst_19 = arith.constant 1.000000e-03 : f32
    %20 = vector.broadcast %cst_19 : f32 to vector<32x128xf32>
    %21 = arith.mulf %19, %20 : vector<32x128xf32>
    %22 = arith.addf %18, %21 : vector<32x128xf32>
    %c0_20 = arith.constant 0 : index
    %c0_21 = arith.constant 0 : index
    %23 = vector.load %arg13[%c0_20, %c0_21] : memref<32x128xf32, #tpu.memory_space<vmem>>, vector<32x128xf32>
    tpu.vector_store %arg13[%c0_20, %c0_21], %22 {strides = array<i32>} : memref<32x128xf32, #tpu.memory_space<vmem>>, vector<32x128xf32>,
    %c0_22 = arith.constant 0 : index
    %c0_23 = arith.constant 0 : index
    %24 = vector.load %arg8[%c0_22, %c0_23] : memref<1x128xf32, #tpu.memory_space<vmem>>, vector<1x128xf32>
    %cst_24 = arith.constant 9.990000e-01 : f32
    %25 = vector.broadcast %cst_24 : f32 to vector<1x128xf32>
    %26 = arith.mulf %24, %25 : vector<1x128xf32>
    %c0_25 = arith.constant 0 : index
    %c0_26 = arith.constant 0 : index
    %27 = vector.load %arg4[%c0_25, %c0_26] : memref<1x128xf32, #tpu.memory_space<vmem>>, vector<1x128xf32>
    %cst_27 = arith.constant 1.000000e-03 : f32
    %28 = vector.broadcast %cst_27 : f32 to vector<1x128xf32>
    %29 = arith.mulf %27, %28 : vector<1x128xf32>
    %30 = arith.addf %26, %29 : vector<1x128xf32>
    %c0_28 = arith.constant 0 : index
    %c0_29 = arith.constant 0 : index
    %31 = vector.load %arg14[%c0_28, %c0_29] : memref<1x128xf32, #tpu.memory_space<vmem>>, vector<1x128xf32>
    tpu.vector_store %arg14[%c0_28, %c0_29], %30 {strides = array<i32>} : memref<1x128xf32, #tpu.memory_space<vmem>>, vector<1x128xf32>,
    %c0_30 = arith.constant 0 : index
    %c0_31 = arith.constant 0 : index
    %32 = vector.load %arg1[%c0_30, %c0_31] : memref<32x4xf32, #tpu.memory_space<vmem>>, vector<32x4xf32>
    %c0_32 = arith.constant 0 : index
    %c0_33 = arith.constant 0 : index
    %33 = vector.load %arg2[%c0_32, %c0_33] : memref<32x1xf32, #tpu.memory_space<vmem>>, vector<32x1xf32>
    %c0_34 = arith.constant 0 : index
    %c0_35 = arith.constant 0 : index
    %34 = vector.load %arg3[%c0_34, %c0_35] : memref<32x128xf32, #tpu.memory_space<vmem>>, vector<32x128xf32>
    %c0_36 = arith.constant 0 : index
    %c0_37 = arith.constant 0 : index
    %35 = vector.load %arg4[%c0_36, %c0_37] : memref<1x128xf32, #tpu.memory_space<vmem>>, vector<1x128xf32>
    %36 = arith.truncf %32 : vector<32x4xf32> to vector<32x4xbf16>
    %c0_38 = arith.constant 0 : index
    %c0_39 = arith.constant 0 : index
    %c0_40 = arith.constant 0 : index
    %37 = vector.load %arg0[%c0_38, %c0_39, %c0_40] : memref<4x4x256xf32, #tpu.memory_space<vmem>>, vector<1x4x256xf32>
    %38 = vector.shape_cast %37 : vector<1x4x256xf32> to vector<4x256xf32>
    %39 = arith.truncf %38 : vector<4x256xf32> to vector<4x256xbf16>
    %cst_41 = arith.constant dense<0.000000e+00> : vector<32x256xf32>
    %40 = tpu.matmul %36, %39, %cst_41 {dimension_numbers = #tpu.dot_dimension_numbers<[1], [0], [0], [1], [0, 0, 1, 1], [], []>} : vector<32x4xbf16>, vector<4x256xbf16>, vector<32x256xf32> -> vector<32x256xf32>
    %41 = vector.broadcast %33 : vector<32x1xf32> to vector<32x256xf32>
    %42 = arith.addf %40, %41 : vector<32x256xf32>
    %cst_42 = arith.constant 0.000000e+00 : f32
    %43 = vector.broadcast %cst_42 : f32 to vector<32x256xf32>
    %44 = arith.maximumf %42, %43 : vector<32x256xf32>
    %cst_43 = arith.constant dense<0.000000e+00> : vector<32xf32>
    %45 = vector.multi_reduction <add>, %44, %cst_43 [1] : vector<32x256xf32> to vector<32xf32>
    %cst_44 = arith.constant 3.906250e-03 : f32
    %46 = vector.broadcast %cst_44 : f32 to vector<32xf32>
    %47 = arith.mulf %45, %46 : vector<32xf32>
    %c0_45 = arith.constant 0 : index
    %c0_46 = arith.constant 0 : index
    %48 = vector.load %arg15[%c0_45, %c0_46] : memref<4x32xf32, #tpu.memory_space<vmem>>, vector<1x32xf32>
    %49 = vector.shape_cast %48 : vector<1x32xf32> to vector<32xf32>
    %50 = vector.shape_cast %47 : vector<32xf32> to vector<1x32xf32>
    tpu.vector_store %arg15[%c0_45, %c0_46], %50 {strides = array<i32>} : memref<4x32xf32, #tpu.memory_space<vmem>>, vector<1x32xf32>,
    %c1 = arith.constant 1 : index
    %c0_47 = arith.constant 0 : index
    %c0_48 = arith.constant 0 : index
    %51 = vector.load %arg0[%c1, %c0_47, %c0_48] : memref<4x4x256xf32, #tpu.memory_space<vmem>>, vector<1x4x256xf32>
    %52 = vector.shape_cast %51 : vector<1x4x256xf32> to vector<4x256xf32>
    %53 = arith.truncf %52 : vector<4x256xf32> to vector<4x256xbf16>
    %cst_49 = arith.constant dense<0.000000e+00> : vector<32x256xf32>
    %54 = tpu.matmul %36, %53, %cst_49 {dimension_numbers = #tpu.dot_dimension_numbers<[1], [0], [0], [1], [0, 0, 1, 1], [], []>} : vector<32x4xbf16>, vector<4x256xbf16>, vector<32x256xf32> -> vector<32x256xf32>
    %55 = vector.broadcast %33 : vector<32x1xf32> to vector<32x256xf32>
    %56 = arith.addf %54, %55 : vector<32x256xf32>
    %cst_50 = arith.constant 0.000000e+00 : f32
    %57 = vector.broadcast %cst_50 : f32 to vector<32x256xf32>
    %58 = arith.maximumf %56, %57 : vector<32x256xf32>
    %cst_51 = arith.constant dense<0.000000e+00> : vector<32xf32>
    %59 = vector.multi_reduction <add>, %58, %cst_51 [1] : vector<32x256xf32> to vector<32xf32>
    %cst_52 = arith.constant 3.906250e-03 : f32
    %60 = vector.broadcast %cst_52 : f32 to vector<32xf32>
    %61 = arith.mulf %59, %60 : vector<32xf32>
    %c1_53 = arith.constant 1 : index
    %c0_54 = arith.constant 0 : index
    %62 = vector.load %arg15[%c1_53, %c0_54] : memref<4x32xf32, #tpu.memory_space<vmem>>, vector<1x32xf32>
    %63 = vector.shape_cast %62 : vector<1x32xf32> to vector<32xf32>
    %64 = vector.shape_cast %61 : vector<32xf32> to vector<1x32xf32>
    tpu.vector_store %arg15[%c1_53, %c0_54], %64 {strides = array<i32>} : memref<4x32xf32, #tpu.memory_space<vmem>>, vector<1x32xf32>,
    %c2 = arith.constant 2 : index
    %c0_55 = arith.constant 0 : index
    %c0_56 = arith.constant 0 : index
    %65 = vector.load %arg0[%c2, %c0_55, %c0_56] : memref<4x4x256xf32, #tpu.memory_space<vmem>>, vector<1x4x256xf32>
    %66 = vector.shape_cast %65 : vector<1x4x256xf32> to vector<4x256xf32>
    %67 = arith.truncf %66 : vector<4x256xf32> to vector<4x256xbf16>
    %cst_57 = arith.constant dense<0.000000e+00> : vector<32x256xf32>
    %68 = tpu.matmul %36, %67, %cst_57 {dimension_numbers = #tpu.dot_dimension_numbers<[1], [0], [0], [1], [0, 0, 1, 1], [], []>} : vector<32x4xbf16>, vector<4x256xbf16>, vector<32x256xf32> -> vector<32x256xf32>
    %69 = vector.broadcast %33 : vector<32x1xf32> to vector<32x256xf32>
    %70 = arith.addf %68, %69 : vector<32x256xf32>
    %cst_58 = arith.constant 0.000000e+00 : f32
    %71 = vector.broadcast %cst_58 : f32 to vector<32x256xf32>
    %72 = arith.maximumf %70, %71 : vector<32x256xf32>
    %cst_59 = arith.constant dense<0.000000e+00> : vector<32xf32>
    %73 = vector.multi_reduction <add>, %72, %cst_59 [1] : vector<32x256xf32> to vector<32xf32>
    %cst_60 = arith.constant 3.906250e-03 : f32
    %74 = vector.broadcast %cst_60 : f32 to vector<32xf32>
    %75 = arith.mulf %73, %74 : vector<32xf32>
    %c2_61 = arith.constant 2 : index
    %c0_62 = arith.constant 0 : index
    %76 = vector.load %arg15[%c2_61, %c0_62] : memref<4x32xf32, #tpu.memory_space<vmem>>, vector<1x32xf32>
    %77 = vector.shape_cast %76 : vector<1x32xf32> to vector<32xf32>
    %78 = vector.shape_cast %75 : vector<32xf32> to vector<1x32xf32>
    tpu.vector_store %arg15[%c2_61, %c0_62], %78 {strides = array<i32>} : memref<4x32xf32, #tpu.memory_space<vmem>>, vector<1x32xf32>,
    %c3 = arith.constant 3 : index
    %c0_63 = arith.constant 0 : index
    %c0_64 = arith.constant 0 : index
    %79 = vector.load %arg0[%c3, %c0_63, %c0_64] : memref<4x4x256xf32, #tpu.memory_space<vmem>>, vector<1x4x256xf32>
    %80 = vector.shape_cast %79 : vector<1x4x256xf32> to vector<4x256xf32>
    %81 = arith.truncf %80 : vector<4x256xf32> to vector<4x256xbf16>
    %cst_65 = arith.constant dense<0.000000e+00> : vector<32x256xf32>
    %82 = tpu.matmul %36, %81, %cst_65 {dimension_numbers = #tpu.dot_dimension_numbers<[1], [0], [0], [1], [0, 0, 1, 1], [], []>} : vector<32x4xbf16>, vector<4x256xbf16>, vector<32x256xf32> -> vector<32x256xf32>
    %83 = vector.broadcast %33 : vector<32x1xf32> to vector<32x256xf32>
    %84 = arith.addf %82, %83 : vector<32x256xf32>
    %cst_66 = arith.constant 0.000000e+00 : f32
    %85 = vector.broadcast %cst_66 : f32 to vector<32x256xf32>
    %86 = arith.maximumf %84, %85 : vector<32x256xf32>
    %cst_67 = arith.constant dense<0.000000e+00> : vector<32xf32>
    %87 = vector.multi_reduction <add>, %86, %cst_67 [1] : vector<32x256xf32> to vector<32xf32>
    %cst_68 = arith.constant 3.906250e-03 : f32
    %88 = vector.broadcast %cst_68 : f32 to vector<32xf32>
    %89 = arith.mulf %87, %88 : vector<32xf32>
    %c3_69 = arith.constant 3 : index
    %c0_70 = arith.constant 0 : index
    %90 = vector.load %arg15[%c3_69, %c0_70] : memref<4x32xf32, #tpu.memory_space<vmem>>, vector<1x32xf32>
    %91 = vector.shape_cast %90 : vector<1x32xf32> to vector<32xf32>
    %92 = vector.shape_cast %89 : vector<32xf32> to vector<1x32xf32>
    tpu.vector_store %arg15[%c3_69, %c0_70], %92 {strides = array<i32>} : memref<4x32xf32, #tpu.memory_space<vmem>>, vector<1x32xf32>,
    %c0_71 = arith.constant 0 : index
    %c0_72 = arith.constant 0 : index
    %93 = vector.load %arg15[%c0_71, %c0_72] : memref<4x32xf32, #tpu.memory_space<vmem>>, vector<4x32xf32>
    %cst_73 = arith.constant dense<0.000000e+00> : vector<4x128xf32>
    %94 = tpu.matmul %93, %34, %cst_73 {dimension_numbers = #tpu.dot_dimension_numbers<[1], [0], [0], [1], [0, 0, 1, 1], [], []>} : vector<4x32xf32>, vector<32x128xf32>, vector<4x128xf32> -> vector<4x128xf32>
    %95 = vector.broadcast %35 : vector<1x128xf32> to vector<4x128xf32>
    %96 = arith.addf %94, %95 : vector<4x128xf32>
    %97 = arith.mulf %96, %96 : vector<4x128xf32>
    %cst_74 = arith.constant dense<0.000000e+00> : vector<4xf32>
    %98 = vector.multi_reduction <add>, %97, %cst_74 [1] : vector<4x128xf32> to vector<4xf32>
    %99 = vector.shape_cast %98 : vector<4xf32> to vector<4x1xf32>
    %cst_75 = arith.constant 1.000000e-24 : f32
    %100 = vector.broadcast %cst_75 : f32 to vector<4x1xf32>
    %101 = arith.maximumf %99, %100 : vector<4x1xf32>
    %102 = math.rsqrt %101 : vector<4x1xf32>
    %103 = vector.broadcast %102 : vector<4x1xf32> to vector<4x128xf32>
    %104 = arith.mulf %96, %103 : vector<4x128xf32>
    %c0_76 = arith.constant 0 : index
    %c0_77 = arith.constant 0 : index
    %105 = vector.load %arg9[%c0_76, %c0_77] : memref<4x128xf32, #tpu.memory_space<vmem>>, vector<4x128xf32>
    tpu.vector_store %arg9[%c0_76, %c0_77], %104 {strides = array<i32>} : memref<4x128xf32, #tpu.memory_space<vmem>>, vector<4x128xf32>,
    %c0_78 = arith.constant 0 : index
    %c0_79 = arith.constant 0 : index
    %106 = vector.load %arg11[%c0_78, %c0_79] : memref<32x4xf32, #tpu.memory_space<vmem>>, vector<32x4xf32>
    %c0_80 = arith.constant 0 : index
    %c0_81 = arith.constant 0 : index
    %107 = vector.load %arg12[%c0_80, %c0_81] : memref<32x1xf32, #tpu.memory_space<vmem>>, vector<32x1xf32>
    %c0_82 = arith.constant 0 : index
    %c0_83 = arith.constant 0 : index
    %108 = vector.load %arg13[%c0_82, %c0_83] : memref<32x128xf32, #tpu.memory_space<vmem>>, vector<32x128xf32>
    %c0_84 = arith.constant 0 : index
    %c0_85 = arith.constant 0 : index
    %109 = vector.load %arg14[%c0_84, %c0_85] : memref<1x128xf32, #tpu.memory_space<vmem>>, vector<1x128xf32>
    %110 = arith.truncf %106 : vector<32x4xf32> to vector<32x4xbf16>
    %c0_86 = arith.constant 0 : index
    %c0_87 = arith.constant 0 : index
    %c0_88 = arith.constant 0 : index
    %111 = vector.load %arg0[%c0_86, %c0_87, %c0_88] : memref<4x4x256xf32, #tpu.memory_space<vmem>>, vector<1x4x256xf32>
    %112 = vector.shape_cast %111 : vector<1x4x256xf32> to vector<4x256xf32>
    %113 = arith.truncf %112 : vector<4x256xf32> to vector<4x256xbf16>
    %cst_89 = arith.constant dense<0.000000e+00> : vector<32x256xf32>
    %114 = tpu.matmul %110, %113, %cst_89 {dimension_numbers = #tpu.dot_dimension_numbers<[1], [0], [0], [1], [0, 0, 1, 1], [], []>} : vector<32x4xbf16>, vector<4x256xbf16>, vector<32x256xf32> -> vector<32x256xf32>
    %115 = vector.broadcast %107 : vector<32x1xf32> to vector<32x256xf32>
    %116 = arith.addf %114, %115 : vector<32x256xf32>
    %cst_90 = arith.constant 0.000000e+00 : f32
    %117 = vector.broadcast %cst_90 : f32 to vector<32x256xf32>
    %118 = arith.maximumf %116, %117 : vector<32x256xf32>
    %cst_91 = arith.constant dense<0.000000e+00> : vector<32xf32>
    %119 = vector.multi_reduction <add>, %118, %cst_91 [1] : vector<32x256xf32> to vector<32xf32>
    %cst_92 = arith.constant 3.906250e-03 : f32
    %120 = vector.broadcast %cst_92 : f32 to vector<32xf32>
    %121 = arith.mulf %119, %120 : vector<32xf32>
    %c0_93 = arith.constant 0 : index
    %c0_94 = arith.constant 0 : index
    %122 = vector.load %arg16[%c0_93, %c0_94] : memref<4x32xf32, #tpu.memory_space<vmem>>, vector<1x32xf32>
    %123 = vector.shape_cast %122 : vector<1x32xf32> to vector<32xf32>
    %124 = vector.shape_cast %121 : vector<32xf32> to vector<1x32xf32>
    tpu.vector_store %arg16[%c0_93, %c0_94], %124 {strides = array<i32>} : memref<4x32xf32, #tpu.memory_space<vmem>>, vector<1x32xf32>,
    %c1_95 = arith.constant 1 : index
    %c0_96 = arith.constant 0 : index
    %c0_97 = arith.constant 0 : index
    %125 = vector.load %arg0[%c1_95, %c0_96, %c0_97] : memref<4x4x256xf32, #tpu.memory_space<vmem>>, vector<1x4x256xf32>
    %126 = vector.shape_cast %125 : vector<1x4x256xf32> to vector<4x256xf32>
    %127 = arith.truncf %126 : vector<4x256xf32> to vector<4x256xbf16>
    %cst_98 = arith.constant dense<0.000000e+00> : vector<32x256xf32>
    %128 = tpu.matmul %110, %127, %cst_98 {dimension_numbers = #tpu.dot_dimension_numbers<[1], [0], [0], [1], [0, 0, 1, 1], [], []>} : vector<32x4xbf16>, vector<4x256xbf16>, vector<32x256xf32> -> vector<32x256xf32>
    %129 = vector.broadcast %107 : vector<32x1xf32> to vector<32x256xf32>
    %130 = arith.addf %128, %129 : vector<32x256xf32>
    %cst_99 = arith.constant 0.000000e+00 : f32
    %131 = vector.broadcast %cst_99 : f32 to vector<32x256xf32>
    %132 = arith.maximumf %130, %131 : vector<32x256xf32>
    %cst_100 = arith.constant dense<0.000000e+00> : vector<32xf32>
    %133 = vector.multi_reduction <add>, %132, %cst_100 [1] : vector<32x256xf32> to vector<32xf32>
    %cst_101 = arith.constant 3.906250e-03 : f32
    %134 = vector.broadcast %cst_101 : f32 to vector<32xf32>
    %135 = arith.mulf %133, %134 : vector<32xf32>
    %c1_102 = arith.constant 1 : index
    %c0_103 = arith.constant 0 : index
    %136 = vector.load %arg16[%c1_102, %c0_103] : memref<4x32xf32, #tpu.memory_space<vmem>>, vector<1x32xf32>
    %137 = vector.shape_cast %136 : vector<1x32xf32> to vector<32xf32>
    %138 = vector.shape_cast %135 : vector<32xf32> to vector<1x32xf32>
    tpu.vector_store %arg16[%c1_102, %c0_103], %138 {strides = array<i32>} : memref<4x32xf32, #tpu.memory_space<vmem>>, vector<1x32xf32>,
    %c2_104 = arith.constant 2 : index
    %c0_105 = arith.constant 0 : index
    %c0_106 = arith.constant 0 : index
    %139 = vector.load %arg0[%c2_104, %c0_105, %c0_106] : memref<4x4x256xf32, #tpu.memory_space<vmem>>, vector<1x4x256xf32>
    %140 = vector.shape_cast %139 : vector<1x4x256xf32> to vector<4x256xf32>
    %141 = arith.truncf %140 : vector<4x256xf32> to vector<4x256xbf16>
    %cst_107 = arith.constant dense<0.000000e+00> : vector<32x256xf32>
    %142 = tpu.matmul %110, %141, %cst_107 {dimension_numbers = #tpu.dot_dimension_numbers<[1], [0], [0], [1], [0, 0, 1, 1], [], []>} : vector<32x4xbf16>, vector<4x256xbf16>, vector<32x256xf32> -> vector<32x256xf32>
    %143 = vector.broadcast %107 : vector<32x1xf32> to vector<32x256xf32>
    %144 = arith.addf %142, %143 : vector<32x256xf32>
    %cst_108 = arith.constant 0.000000e+00 : f32
    %145 = vector.broadcast %cst_108 : f32 to vector<32x256xf32>
    %146 = arith.maximumf %144, %145 : vector<32x256xf32>
    %cst_109 = arith.constant dense<0.000000e+00> : vector<32xf32>
    %147 = vector.multi_reduction <add>, %146, %cst_109 [1] : vector<32x256xf32> to vector<32xf32>
    %cst_110 = arith.constant 3.906250e-03 : f32
    %148 = vector.broadcast %cst_110 : f32 to vector<32xf32>
    %149 = arith.mulf %147, %148 : vector<32xf32>
    %c2_111 = arith.constant 2 : index
    %c0_112 = arith.constant 0 : index
    %150 = vector.load %arg16[%c2_111, %c0_112] : memref<4x32xf32, #tpu.memory_space<vmem>>, vector<1x32xf32>
    %151 = vector.shape_cast %150 : vector<1x32xf32> to vector<32xf32>
    %152 = vector.shape_cast %149 : vector<32xf32> to vector<1x32xf32>
    tpu.vector_store %arg16[%c2_111, %c0_112], %152 {strides = array<i32>} : memref<4x32xf32, #tpu.memory_space<vmem>>, vector<1x32xf32>,
    %c3_113 = arith.constant 3 : index
    %c0_114 = arith.constant 0 : index
    %c0_115 = arith.constant 0 : index
    %153 = vector.load %arg0[%c3_113, %c0_114, %c0_115] : memref<4x4x256xf32, #tpu.memory_space<vmem>>, vector<1x4x256xf32>
    %154 = vector.shape_cast %153 : vector<1x4x256xf32> to vector<4x256xf32>
    %155 = arith.truncf %154 : vector<4x256xf32> to vector<4x256xbf16>
    %cst_116 = arith.constant dense<0.000000e+00> : vector<32x256xf32>
    %156 = tpu.matmul %110, %155, %cst_116 {dimension_numbers = #tpu.dot_dimension_numbers<[1], [0], [0], [1], [0, 0, 1, 1], [], []>} : vector<32x4xbf16>, vector<4x256xbf16>, vector<32x256xf32> -> vector<32x256xf32>
    %157 = vector.broadcast %107 : vector<32x1xf32> to vector<32x256xf32>
    %158 = arith.addf %156, %157 : vector<32x256xf32>
    %cst_117 = arith.constant 0.000000e+00 : f32
    %159 = vector.broadcast %cst_117 : f32 to vector<32x256xf32>
    %160 = arith.maximumf %158, %159 : vector<32x256xf32>
    %cst_118 = arith.constant dense<0.000000e+00> : vector<32xf32>
    %161 = vector.multi_reduction <add>, %160, %cst_118 [1] : vector<32x256xf32> to vector<32xf32>
    %cst_119 = arith.constant 3.906250e-03 : f32
    %162 = vector.broadcast %cst_119 : f32 to vector<32xf32>
    %163 = arith.mulf %161, %162 : vector<32xf32>
    %c3_120 = arith.constant 3 : index
    %c0_121 = arith.constant 0 : index
    %164 = vector.load %arg16[%c3_120, %c0_121] : memref<4x32xf32, #tpu.memory_space<vmem>>, vector<1x32xf32>
    %165 = vector.shape_cast %164 : vector<1x32xf32> to vector<32xf32>
    %166 = vector.shape_cast %163 : vector<32xf32> to vector<1x32xf32>
    tpu.vector_store %arg16[%c3_120, %c0_121], %166 {strides = array<i32>} : memref<4x32xf32, #tpu.memory_space<vmem>>, vector<1x32xf32>,
    %c0_122 = arith.constant 0 : index
    %c0_123 = arith.constant 0 : index
    %167 = vector.load %arg16[%c0_122, %c0_123] : memref<4x32xf32, #tpu.memory_space<vmem>>, vector<4x32xf32>
    %cst_124 = arith.constant dense<0.000000e+00> : vector<4x128xf32>
    %168 = tpu.matmul %167, %108, %cst_124 {dimension_numbers = #tpu.dot_dimension_numbers<[1], [0], [0], [1], [0, 0, 1, 1], [], []>} : vector<4x32xf32>, vector<32x128xf32>, vector<4x128xf32> -> vector<4x128xf32>
    %169 = vector.broadcast %109 : vector<1x128xf32> to vector<4x128xf32>
    %170 = arith.addf %168, %169 : vector<4x128xf32>
    %171 = arith.mulf %170, %170 : vector<4x128xf32>
    %cst_125 = arith.constant dense<0.000000e+00> : vector<4xf32>
    %172 = vector.multi_reduction <add>, %171, %cst_125 [1] : vector<4x128xf32> to vector<4xf32>
    %173 = vector.shape_cast %172 : vector<4xf32> to vector<4x1xf32>
    %cst_126 = arith.constant 1.000000e-24 : f32
    %174 = vector.broadcast %cst_126 : f32 to vector<4x1xf32>
    %175 = arith.maximumf %173, %174 : vector<4x1xf32>
    %176 = math.rsqrt %175 : vector<4x1xf32>
    %177 = vector.broadcast %176 : vector<4x1xf32> to vector<4x128xf32>
    %178 = arith.mulf %170, %177 : vector<4x128xf32>
    %c0_127 = arith.constant 0 : index
    %c0_128 = arith.constant 0 : index
    %179 = vector.load %arg10[%c0_127, %c0_128] : memref<4x128xf32, #tpu.memory_space<vmem>>, vector<4x128xf32>
    tpu.vector_store %arg10[%c0_127, %c0_128], %178 {strides = array<i32>} : memref<4x128xf32, #tpu.memory_space<vmem>>, vector<4x128xf32>,
    return
  }
}

</mosaic_0001>

<bundles_post_ra>
// kernel: tpu_custom_call.1
= control target key start
LH: loop header
LB: loop body
LE: loop exit
PB: predicated region body
PF: predicated region fallthrough
CT: control target
= control target key end

     0   :  { %20 = vsyncpa [#allocation5], 0  ;;  %v1178_v1 = vmov 0   ;;  %s1738_s0 = inlined_call_operand.vmem [shape: f32[4,4,256], index: 0, kind: input, shape index: {}]   ;;  %s1739_s1 = inlined_call_operand.vmem [shape: f32[32,4], index: 1, kind: input, shape index: {}]   ;;  %s1740_s2 = inlined_call_operand.vmem [shape: f32[32,1], index: 2, kind: input, shape index: {}]   ;;  %s1741_s3 = inlined_call_operand.vmem [shape: f32[32,128], index: 3, kind: input, shape index: {}]   ;;  %s1742_s4 = inlined_call_operand.vmem [shape: f32[1,128], index: 4, kind: input, shape index: {}]   ;;  %s1743_s5 = inlined_call_operand.vmem [shape: f32[32,4], index: 5, kind: input, shape index: {}, may-alias: {5,11}]   ;;  %s1744_s6 = inlined_call_operand.vmem [shape: f32[32,1], index: 6, kind: input, shape index: {}, may-alias: {6,12}]   ;;  %s1745_s7 = inlined_call_operand.vmem [shape: f32[32,128], index: 7, kind: input, shape index: {}, may-alias: {7,13}]   ;;  %s1746_s8 = inlined_call_operand.vmem [shape: f32[1,128], index: 8, kind: input, shape index: {}, may-alias: {8,14}]   ;;  %s1747_s9 = inlined_call_operand.hbm [shape: f32[4,128], index: 9, kind: output, shape index: {0}]   ;;  %s1748_s10 = inlined_call_operand.hbm [shape: f32[4,128], index: 10, kind: output, shape index: {1}]   ;;  %s1749_s11 = inlined_call_operand.vmem [shape: f32[32,4], index: 11, kind: output, shape index: {2}, may-alias: {5,11}]   ;;  %s1750_s12 = inlined_call_operand.vmem [shape: f32[32,1], index: 12, kind: output, shape index: {3}, may-alias: {6,12}]   ;;  %s1751_s13 = inlined_call_operand.vmem [shape: f32[32,128], index: 13, kind: output, shape index: {4}, may-alias: {7,13}]   ;;  %s1752_s14 = inlined_call_operand.vmem [shape: f32[1,128], index: 14, kind: output, shape index: {5}, may-alias: {8,14}]  }
   0x1   :  { %v1259_v0 = vld [vmem:[%s1738_s0] sm:$0xff]  ;;  %1117 = vset.pattern.permute.xlu0 %v1178_v1  ;;  %1118 = vset.pattern.permute.xlu1 %v1178_v1  ;;  %v1271_v3 = vld [vmem:[%s1740_s2 + $0x10] sm:$0xff] }
   0x2   :  { %138 = vst [vmem:[#allocation1] ss:$2 sm:$0xff] %v1259_v0  ;;  %v1265_v2 = vld [vmem:[%s1740_s2] sm:$0xff]  ;;  %1119 = vset.pattern.permute.xlu2 %v1178_v1  ;;  %157 = vperm.xlu1 %1118, %v1271_v3  }
   0x3   :  { %147 = vperm.xlu0 %1117, %v1265_v2  }
   0x4   :  { %21 = vsyncpa [#allocation7], 0  ;;  %v1277_v4 = vld [vmem:[%s1738_s0 + $0x8] sm:$0xff]  ;;  %vm171_vm0 = vcmask 1041408   ;;  %v1282_v5 = vld [vmem:[%s1739_s1] sm:$0xff]  ;;  %vm61_vm1 = vcmask 31744  }
   0x5   :  { %v1287_v6 = vld [vmem:[%s1739_s1 + $0x8] sm:$0xff]  ;;  %v1299_v12 = vld [vmem:[%s1740_s2 + $0x18] sm:$0xff]  ;;  %v1309_v16 = vld [vmem:[%s1738_s0 + $0x10] sm:$0xff]  ;;  %v53_v45 = vmul.f32 0.001, %v1282_v5  ;;  %vm86_vm2 = vcmask 7168  }
   0x6   :  { %v1292_v7 = vld [vmem:[%s1740_s2 + $0x8] sm:$0xff]  ;;  %v134_v15 = vpack.c.bf16 %v1287_v6, %v1282_v5  ;;  %v1319_v23 = vld [vmem:[%s1738_s0 + $0x18] sm:$0xff]  ;;  %v1326_v24 = vld [vmem:[%s1739_s1 + $0x10] sm:$0xff]  ;;  %v54_v46 = vmul.f32 0.001, %v1287_v6  ;;  %vm249_vm3 = vcmask 130112  }
   0x7   :  { %v1331_v25 = vld [vmem:[%s1739_s1 + $0x18] sm:$0xff]  ;;  %v41_v41 = vld [vmem:[%s1743_s5] sm:$0xff]  ;;  %v42_v42 = vld [vmem:[%s1743_s5 + $0x8] sm:$0xff]  ;;  %vm253_vm4 = vcmask 195712   ;;  %vm257_vm5 = vcmask 261312   ;;  %vm260_vm6 = vcmask 253952  }
   0x8   :  { %v135_v30 = vpack.c.bf16 %v1331_v25, %v1326_v24  ;;  %v45_v43 = vmul.f32 0.999, %v41_v41  ;;  %v46_v44 = vmul.f32 0.999, %v42_v42  ;;  %v56_v1 = vmul.f32 0.001, %v1331_v25 }
   0x9   :  { %v139_v8 = vld.sshfl [vmem:[#allocation1] sm:$0xff pattern:$0x75316420]  ;;  %v140_v9 = vld.sshfl [vmem:[#allocation1 + $0x8] sm:$0xff pattern:$0x75316420] }
   0xa   :  { %v143_v10 = vpack.c.bf16 %v139_v8, %v139_v8  ;;  %v144_v11 = vpack.c.bf16 %v140_v9, %v140_v9  ;;  %265 = vst [vmem:[#allocation1] ss:$2 sm:$0xff] %v1277_v4  ;;  %162 = vperm.xlu1 %1118, %v1299_v12   ;;  %v57_v47 = vadd.f32 %v53_v45, %v45_v43  ;;  %vm539_vm7 = vcmask 261120   ;;  %s1179_s30 = smov [#allocation4]  }
   0xb   :  { %152 = vperm.xlu0 %1117, %v1292_v7   ;;  %v58_v48 = vadd.f32 %v54_v46, %v46_v44  ;;  %vm564_vm8 = vcmask 1043456   ;;  %s1031_s2 = sshll.u32 %s1179_s30, 4  ;;  %s1032_s2 = int_to_ptr.vmem [resolvable:$true] %s1031_s2 }
   0xc   :  { %v173_v13 = vsel %vm171_vm0, %v143_v10, 0  ;;  %v176_v14 = vsel %vm171_vm0, %v144_v11, 0  ;;  %62 = vst.msk [vmem:[%s1749_s11] sm:$0xff] %vm61_vm1, %v57_v47 }
   0xd   :  { %185 = vmatpush.bf16.msra.mxu0 %v173_v13  ;;  %204 = vmatpush.bf16.msra.mxu1 %v176_v14  ;;  %63 = vst.msk [vmem:[%s1749_s11 + $0x8] sm:$0xff] %vm61_vm1, %v58_v48 }
  0x10   :  { %1074 = vmatmul.msk.bf16.vlgmr.msra.gmra.mxu0 %vm61_vm1, %v134_v15  ;;  %1076 = vmatmul.msk.bf16.vlgmr.msra.gmra.mxu1 %vm61_vm1, %v134_v15 }
  0x11   :  { %v266_v17 = vld.sshfl [vmem:[#allocation1] sm:$0xff pattern:$0x75316420]  ;;  %v267_v18 = vld.sshfl [vmem:[#allocation1 + $0x8] sm:$0xff pattern:$0x75316420] }
  0x12   :  { %v270_v19 = vpack.c.bf16 %v266_v17, %v266_v17  ;;  %v271_v20 = vpack.c.bf16 %v267_v18, %v267_v18  ;;  %356 = vst [vmem:[#allocation1] ss:$2 sm:$0xff] %v1309_v16 }
  0x13   :  { %v581_v54 = vld [vmem:[%s1749_s11] sm:$0xff] }
  0x14   :  { %v273_v21 = vsel %vm171_vm0, %v270_v19, 0  ;;  %v276_v22 = vsel %vm171_vm0, %v271_v20, 0  ;;  %v582_v56 = vld [vmem:[%s1749_s11 + $0x8] sm:$0xff]  ;;  %v43_v59 = vld [vmem:[%s1743_s5 + $0x10] sm:$0xff]  ;;  %v44_v60 = vld [vmem:[%s1743_s5 + $0x18] sm:$0xff]  ;;  %s1044_s5 = sshll.u32 %s1748_s10, 4  ;;  %s1045_s5 = int_to_ptr.hbm [resolvable:$true] %s1044_s5 }
  0x15   :  { %285 = vmatpush.bf16.msra.mxu2 %v273_v21  ;;  %304 = vmatpush.bf16.msra.mxu3 %v276_v22  ;;  %v1380_v57 = vpack.c.bf16 %v582_v56, %v581_v54  ;;  %v47_v62 = vmul.f32 0.999, %v43_v59  ;;  %v48_v63 = vmul.f32 0.999, %v44_v60 }
  0x17   :  { %v60_v5 = vadd.f32 %v56_v1, %v48_v63 }
  0x18   :  { %1079 = vmatmul.msk.bf16.vlgmr.msra.gmra.mxu2 %vm61_vm1, %v134_v15  ;;  %1081 = vmatmul.msk.bf16.vlgmr.msra.gmra.mxu3 %vm61_vm1, %v134_v15 }
  0x19   :  { %v357_v26 = vld.sshfl [vmem:[#allocation1] sm:$0xff pattern:$0x75316420]  ;;  %v358_v27 = vld.sshfl [vmem:[#allocation1 + $0x8] sm:$0xff pattern:$0x75316420] }
  0x1a   :  { %v361_v28 = vpack.c.bf16 %v357_v26, %v357_v26  ;;  %v362_v29 = vpack.c.bf16 %v358_v27, %v358_v27  ;;  %447 = vst [vmem:[#allocation1] ss:$2 sm:$0xff] %v1319_v23 }
  0x1b   :  { %65 = vst.msk [vmem:[%s1749_s11 + $0x18] sm:$0xff] %vm61_vm1, %v60_v5 }
  0x1c   :  { %v364_v31 = vsel %vm171_vm0, %v361_v28, 0  ;;  %v367_v32 = vsel %vm171_vm0, %v362_v29, 0 }
  0x1d   :  { %376 = vmatpush.bf16.msrb.mxu0 %v364_v31  ;;  %395 = vmatpush.bf16.msrb.mxu1 %v367_v32 }
  0x20   :  { %1075 = vmatmul.msk.bf16.gmra.mxu0 %vm61_vm1, %v135_v30  ;;  %1077 = vmatmul.msk.bf16.gmra.mxu1 %vm61_vm1, %v135_v30 }
  0x21   :  { %v448_v33 = vld.sshfl [vmem:[#allocation1] sm:$0xff pattern:$0x75316420]  ;;  %v449_v34 = vld.sshfl [vmem:[#allocation1 + $0x8] sm:$0xff pattern:$0x75316420] }
  0x22   :  { %v452_v35 = vpack.c.bf16 %v448_v33, %v448_v33  ;;  %v453_v36 = vpack.c.bf16 %v449_v34, %v449_v34  ;;  %598 = vst [vmem:[#allocation1] ss:$2 sm:$0xff] %v1259_v0  ;;  %v55_v0 = vmul.f32 0.001, %v1326_v24  ;;  %v584_v14 = vld [vmem:[%s1749_s11 + $0x18] sm:$0xff] }
  0x24   :  { %v455_v37 = vsel %vm171_vm0, %v452_v35, 0  ;;  %v458_v38 = vsel %vm171_vm0, %v453_v36, 0 }
  0x25   :  { %467 = vmatpush.bf16.msrb.mxu2 %v455_v37  ;;  %486 = vmatpush.bf16.msrb.mxu3 %v458_v38 }
  0x28   :  { %1080 = vmatmul.msk.bf16.gmra.mxu2 %vm61_vm1, %v135_v30  ;;  %1082 = vmatmul.msk.bf16.gmra.mxu3 %vm61_vm1, %v135_v30 }
  0x29   :  { %v599_v39 = vld.sshfl [vmem:[#allocation1] sm:$0xff pattern:$0x75316420]  ;;  %v600_v40 = vld.sshfl [vmem:[#allocation1 + $0x8] sm:$0xff pattern:$0x75316420] }
  0x2a   :  { %714 = vst [vmem:[#allocation1] ss:$2 sm:$0xff] %v1277_v4  ;;  %v604_v50 = vpack.c.bf16 %v600_v40, %v600_v40  ;;  %v603_v58 = vpack.c.bf16 %v599_v39, %v599_v39  ;;  %v59_v4 = vadd.f32 %v55_v0, %v47_v62 }
  0x2c   :  { %v635_v52 = vsel %vm171_vm0, %v604_v50, 0  ;;  %v632_v61 = vsel %vm171_vm0, %v603_v58, 0  ;;  %64 = vst.msk [vmem:[%s1749_s11 + $0x10] sm:$0xff] %vm61_vm1, %v59_v4 }
  0x2d   :  { %663 = vmatpush.bf16.msra.mxu2 %v635_v52  ;;  %644 = vmatpush.bf16.msra.mxu1 %v632_v61 }
  0x30   :  { %1084 = vmatmul.msk.bf16.vlgmr.msrb.gmra.mxu0 %vm61_vm1, %v134_v15  ;;  %1086 = vmatmul.msk.bf16.vlgmr.msrb.gmra.mxu1 %vm61_vm1, %v134_v15 }
  0x31   :  { %v715_v49 = vld.sshfl [vmem:[#allocation1] sm:$0xff pattern:$0x75316420]  ;;  %v1375_v55 = vld.sshfl [vmem:[#allocation1 + $0x8] sm:$0xff pattern:$0x75316420] }
  0x32   :  { %v719_v51 = vpack.c.bf16 %v715_v49, %v715_v49  ;;  %804 = vst [vmem:[#allocation1] ss:$2 sm:$0xff] %v1309_v16 }
  0x33   :  { %v583_v10 = vld [vmem:[%s1749_s11 + $0x10] sm:$0xff] }
  0x34   :  { %v722_v53 = vsel %vm171_vm0, %v719_v51, 0 }
  0x35   :  { %734 = vmatpush.bf16.msra.mxu3 %v722_v53 }
  0x38   :  { %1089 = vmatmul.msk.bf16.vlgmr.msrb.gmra.mxu2 %vm61_vm1, %v134_v15  ;;  %1091 = vmatmul.msk.bf16.vlgmr.msrb.gmra.mxu3 %vm61_vm1, %v134_v15  ;;  %v1416_v15 = vpack.c.bf16 %v584_v14, %v583_v10 }
  0x39   :  { %v805_v18 = vld.sshfl [vmem:[#allocation1] sm:$0xff pattern:$0x75316420]  ;;  %v806_v19 = vld.sshfl [vmem:[#allocation1 + $0x8] sm:$0xff pattern:$0x75316420] }
  0x3a   :  { %894 = vst [vmem:[#allocation1] ss:$2 sm:$0xff] %v1319_v23  ;;  %v810_v29 = vpack.c.bf16 %v806_v19, %v806_v19  ;;  %v809_v45 = vpack.c.bf16 %v805_v18, %v805_v18 }
  0x3c   :  { %v815_v35 = vsel %vm171_vm0, %v810_v29, 0  ;;  %v812_v49 = vsel %vm171_vm0, %v809_v45, 0 }
  0x3d   :  { %843 = vmatpush.bf16.msrb.mxu2 %v815_v35  ;;  %824 = vmatpush.bf16.msrb.mxu1 %v812_v49 }
  0x40   :  { %1085 = vmatmul.msk.bf16.gmra.mxu0 %vm61_vm1, %v135_v30  ;;  %1087 = vmatmul.msk.bf16.gmra.mxu1 %vm61_vm1, %v135_v30 }
  0x48   :  { %1090 = vmatmul.msk.bf16.gmra.mxu2 %vm61_vm1, %v135_v30  ;;  %1092 = vmatmul.msk.bf16.gmra.mxu3 %vm61_vm1, %v135_v30  ;;  %v895_v30 = vld.sshfl [vmem:[#allocation1] sm:$0xff pattern:$0x75316420] }
  0x49   :  { %v899_v23 = vpack.c.bf16 %v895_v30, %v895_v30 }
  0x4b   :  { %v902_v38 = vsel %vm171_vm0, %v899_v23, 0 }
  0x4c   :  { %914 = vmatpush.bf16.msrb.mxu3 %v902_v38 }
  0x50   :  { %1094 = vmatmul.msk.bf16.vlgmr.msra.gmra.mxu1 %vm61_vm1, %v1380_v57 }
  0x58   :  { %1096 = vmatmul.msk.bf16.vlgmr.msra.gmra.mxu2 %vm61_vm1, %v1380_v57  ;;  %1099 = vmatmul.msk.bf16.vlgmr.msra.gmra.mxu3 %vm61_vm1, %v1380_v57 }
  0x60   :  { %1095 = vmatmul.msk.bf16.gmra.mxu1 %vm61_vm1, %v1416_v15 }
  0x68   :  { %1097 = vmatmul.msk.bf16.gmra.mxu2 %vm61_vm1, %v1416_v15  ;;  %1100 = vmatmul.msk.bf16.gmra.mxu3 %vm61_vm1, %v1416_v15 }
  0x70   :  { %1104 = vmatmul.msk.bf16.vlgmr.msrb.gmra.mxu1 %vm61_vm1, %v1380_v57 }
  0x74   :  { %v1429_v32 = vpop.permute.xlu1 %157 }
  0x75   :  { %v1406_v6 = vpop.permute.xlu0 %147 }
  0x78   :  { %1106 = vmatmul.msk.bf16.vlgmr.msrb.gmra.mxu2 %vm61_vm1, %v1380_v57  ;;  %1109 = vmatmul.msk.bf16.vlgmr.msrb.gmra.mxu3 %vm61_vm1, %v1380_v57 }
  0x7c   :  { %v1444_v56 = vpop.permute.xlu1 %162 }
  0x7d   :  { %v1423_v21 = vpop.permute.xlu0 %152 }
  0x80   :  { %1105 = vmatmul.msk.bf16.gmra.mxu1 %vm61_vm1, %v1416_v15 }
  0x88   :  { %1107 = vmatmul.msk.bf16.gmra.mxu2 %vm61_vm1, %v1416_v15  ;;  %1110 = vmatmul.msk.bf16.gmra.mxu3 %vm61_vm1, %v1416_v15 }
  0x8d   :  { %v187_v8 = vpop.f32.mrf.mxu0  ;;  %v206_v9 = vpop.f32.mrf.mxu1 }
  0x8e   :  { %v188_v11 = vadd.f32 %v187_v8, %v1406_v6  ;;  %v207_v13 = vadd.f32 %v206_v9, %v1406_v6 }
  0x90   :  { %v216_v16 = vmax.f32 %v188_v11, 0.0  ;;  %v217_v17 = vmax.f32 %v207_v13, 0.0 }
  0x92   :  { %v224_v20 = vadd.f32 %v217_v17, %v216_v16 }
  0x94   :  { %225 = vadd.xlane.f32.xlu2 %v224_v20 }
  0x95   :  { %v189_v22 = vpop.f32.mrf.mxu0  ;;  %v208_v24 = vpop.f32.mrf.mxu1 }
  0x96   :  { %v190_v25 = vadd.f32 %v189_v22, %v1423_v21  ;;  %v209_v26 = vadd.f32 %v208_v24, %v1423_v21 }
  0x98   :  { %v218_v27 = vmax.f32 %v190_v25, 0.0  ;;  %v219_v28 = vmax.f32 %v209_v26, 0.0  ;;  %v66_v25 = vld [vmem:[%s1744_s6] sm:$0xff] }
  0x99   :  { %v70_v26 = vmul.f32 0.999, %v66_v25 }
  0x9a   :  { %v227_v31 = vadd.f32 %v219_v28, %v218_v27  ;;  %v78_v27 = vmul.f32 0.001, %v1265_v2 }
  0x9b   :  { %v287_v33 = vpop.f32.mrf.mxu2  ;;  %v306_v34 = vpop.f32.mrf.mxu3 }
  0x9c   :  { %v288_v36 = vadd.f32 %v287_v33, %v1406_v6  ;;  %v307_v37 = vadd.f32 %v306_v34, %v1406_v6  ;;  %228 = vadd.xlane.f32.xlu2 %v227_v31  ;;  %v82_v23 = vadd.f32 %v78_v27, %v70_v26 }
  0x9d   :  { %v192_v39 = vpop.f32.mrf.mxu0  ;;  %v211_v40 = vpop.f32.mrf.mxu1 }
  0x9e   :  { %v316_v41 = vmax.f32 %v288_v36, 0.0  ;;  %v317_v42 = vmax.f32 %v307_v37, 0.0  ;;  %v193_v43 = vadd.f32 %v192_v39, %v1429_v32  ;;  %v212_v44 = vadd.f32 %v211_v40, %v1429_v32  ;;  %87 = vst.msk [vmem:[%s1750_s12] sm:$0xff] %vm86_vm2, %v82_v23 }
  0x9f   :  { %v81_v39 = vmul.f32 0.001, %v1299_v12 }
  0xa0   :  { %v220_v46 = vmax.f32 %v193_v43, 0.0  ;;  %v221_v47 = vmax.f32 %v212_v44, 0.0  ;;  %v324_v48 = vadd.f32 %v317_v42, %v316_v41 }
  0xa2   :  { %325 = vadd.xlane.f32.xlu0 %v324_v48  ;;  %v230_v50 = vadd.f32 %v221_v47, %v220_v46 }
  0xa3   :  { %v289_v51 = vpop.f32.mrf.mxu2  ;;  %v308_v52 = vpop.f32.mrf.mxu3 }
  0xa4   :  { %v290_v53 = vadd.f32 %v289_v51, %v1423_v21  ;;  %v309_v54 = vadd.f32 %v308_v52, %v1423_v21  ;;  %231 = vadd.xlane.f32.xlu2 %v230_v50 }
  0xa5   :  { %v194_v58 = vpop.f32.mrf.mxu0  ;;  %v213_v59 = vpop.f32.mrf.mxu1  ;;  %v69_v37 = vld [vmem:[%s1744_s6 + $0x18] sm:$0xff] }
  0xa6   :  { %v318_v60 = vmax.f32 %v290_v53, 0.0  ;;  %v319_v61 = vmax.f32 %v309_v54, 0.0  ;;  %v195_v62 = vadd.f32 %v194_v58, %v1444_v56  ;;  %v214_v63 = vadd.f32 %v213_v59, %v1444_v56 }
  0xa7   :  { %v73_v38 = vmul.f32 0.999, %v69_v37 }
  0xa8   :  { %v222_v0 = vmax.f32 %v195_v62, 0.0  ;;  %v223_v1 = vmax.f32 %v214_v63, 0.0  ;;  %v327_v4 = vadd.f32 %v319_v61, %v318_v60 }
  0xa9   :  { %v85_v46 = vadd.f32 %v81_v39, %v73_v38 }
  0xaa   :  { %328 = vadd.xlane.f32.xlu1 %v327_v4  ;;  %v233_v5 = vadd.f32 %v223_v1, %v222_v0  ;;  %v79_v1 = vmul.f32 0.001, %v1292_v7 }
  0xab   :  { %v292_v8 = vpop.f32.mrf.mxu2  ;;  %v311_v9 = vpop.f32.mrf.mxu3  ;;  %90 = vst.msk [vmem:[%s1750_s12 + $0x18] sm:$0xff] %vm86_vm2, %v85_v46 }
  0xac   :  { %v293_v10 = vadd.f32 %v292_v8, %v1429_v32  ;;  %v312_v11 = vadd.f32 %v311_v9, %v1429_v32  ;;  %234 = vadd.xlane.f32.xlu2 %v233_v5 }
  0xad   :  { %v378_v13 = vpop.f32.mrf.mxu0  ;;  %v397_v14 = vpop.f32.mrf.mxu1 }
  0xae   :  { %v320_v16 = vmax.f32 %v293_v10, 0.0  ;;  %v321_v17 = vmax.f32 %v312_v11, 0.0  ;;  %v379_v18 = vadd.f32 %v378_v13, %v1406_v6  ;;  %v398_v19 = vadd.f32 %v397_v14, %v1406_v6 }
  0xb0   :  { %v330_v20 = vadd.f32 %v321_v17, %v320_v16  ;;  %v407_v30 = vmax.f32 %v379_v18, 0.0  ;;  %v408_v31 = vmax.f32 %v398_v19, 0.0 }
  0xb2   :  { %v415_v35 = vadd.f32 %v408_v31, %v407_v30  ;;  %v67_v63 = vld [vmem:[%s1744_s6 + $0x8] sm:$0xff] }
  0xb3   :  { %v294_v22 = vpop.f32.mrf.mxu2  ;;  %v313_v24 = vpop.f32.mrf.mxu3  ;;  %v71_v0 = vmul.f32 0.999, %v67_v63  ;;  %v1542_v63 = vld [vmem:[%s1741_s3 + $0x18] sm:$0xff] }
  0xb4   :  { %331 = vadd.xlane.f32.xlu2 %v330_v20  ;;  %v295_v49 = vadd.f32 %v294_v22, %v1444_v56  ;;  %v314_v50 = vadd.f32 %v313_v24, %v1444_v56  ;;  %555 = vmatpush.msra.mxu0 %v1542_v63 }
  0xb5   :  { %v380_v28 = vpop.f32.mrf.mxu0  ;;  %v399_v29 = vpop.f32.mrf.mxu1  ;;  %v83_v4 = vadd.f32 %v79_v1, %v71_v0 }
  0xb6   :  { %v381_v33 = vadd.f32 %v380_v28, %v1423_v21  ;;  %v400_v34 = vadd.f32 %v399_v29, %v1423_v21  ;;  %v322_v59 = vmax.f32 %v295_v49, 0.0  ;;  %v323_v60 = vmax.f32 %v314_v50, 0.0 }
  0xb7   :  { %88 = vst.msk [vmem:[%s1750_s12 + $0x8] sm:$0xff] %vm86_vm2, %v83_v4  ;;  %v80_v29 = vmul.f32 0.001, %v1271_v3  ;;  %v585_v3 = vld [vmem:[%s1750_s12] sm:$0xff] }
  0xb8   :  { %v409_v42 = vmax.f32 %v381_v33, 0.0  ;;  %v410_v43 = vmax.f32 %v400_v34, 0.0  ;;  %v333_v8 = vadd.f32 %v323_v60, %v322_v59 }
  0xba   :  { %v418_v53 = vadd.f32 %v410_v43, %v409_v42  ;;  %v244_v42 = vlaneseq }
  0xbb   :  { %v469_v2 = vpop.f32.mrf.mxu2  ;;  %v488_v36 = vpop.f32.mrf.mxu3 }
  0xbc   :  { %416 = vadd.xlane.f32.xlu2 %v415_v35  ;;  %v470_v12 = vadd.f32 %v469_v2, %v1406_v6  ;;  %v489_v51 = vadd.f32 %v488_v36, %v1406_v6 }
  0xbd   :  { %v383_v40 = vpop.f32.mrf.mxu0  ;;  %v402_v41 = vpop.f32.mrf.mxu1 }
  0xbe   :  { %v384_v44 = vadd.f32 %v383_v40, %v1429_v32  ;;  %v403_v45 = vadd.f32 %v402_v41, %v1429_v32  ;;  %v498_v61 = vmax.f32 %v470_v12, 0.0  ;;  %v499_v62 = vmax.f32 %v489_v51, 0.0  ;;  %v586_v38 = vld [vmem:[%s1750_s12 + $0x8] sm:$0xff] }
  0xc0   :  { %v411_v47 = vmax.f32 %v384_v44, 0.0  ;;  %v412_v48 = vmax.f32 %v403_v45, 0.0  ;;  %v506_v9 = vadd.f32 %v499_v62, %v498_v61  ;;  %v1520_v44 = vand.u32 127, %v244_v42 }
  0xc2   :  { %v421_v52 = vadd.f32 %v412_v48, %v411_v47  ;;  %v1523_v45 = vadd.s32 4294967288, %v1520_v44  ;;  %v1526_v47 = vadd.s32 4294967280, %v1520_v44  ;;  %v1530_v12 = vadd.s32 4294967272, %v1520_v44 }
  0xc3   :  { %v471_v54 = vpop.f32.mrf.mxu2  ;;  %v490_v58 = vpop.f32.mrf.mxu3 }
  0xc4   :  { %422 = vadd.xlane.f32.xlu0 %v421_v52  ;;  %419 = vadd.xlane.f32.xlu2 %v418_v53  ;;  %v472_v6 = vadd.f32 %v471_v54, %v1423_v21  ;;  %v491_v5 = vadd.f32 %v490_v58, %v1423_v21 }
  0xc5   :  { %v385_v13 = vpop.f32.mrf.mxu0  ;;  %v404_v7 = vpop.f32.mrf.mxu1 }
  0xc6   :  { %v500_v17 = vmax.f32 %v472_v6, 0.0  ;;  %v501_v18 = vmax.f32 %v491_v5, 0.0  ;;  %v386_v20 = vadd.f32 %v385_v13, %v1444_v56  ;;  %v405_v22 = vadd.f32 %v404_v7, %v1444_v56  ;;  %v1548_v5 = vld [vmem:[%s1741_s3 + $0x10] sm:$0xff] }
  0xc7   :  { %556 = vmatpush.msra.mxu0 %v1548_v5 }
  0xc8   :  { %v509_v25 = vadd.f32 %v501_v18, %v500_v17  ;;  %v413_v26 = vmax.f32 %v386_v20, 0.0  ;;  %v414_v30 = vmax.f32 %v405_v22, 0.0 }
  0xca   :  { %v424_v36 = vadd.f32 %v414_v30, %v413_v26  ;;  %v720_v26 = vpack.c.bf16 %v1375_v55, %v1375_v55 }
  0xcb   :  { %v474_v10 = vpop.f32.mrf.mxu2  ;;  %v493_v11 = vpop.f32.mrf.mxu3 }
  0xcc   :  { %v475_v14 = vadd.f32 %v474_v10, %v1429_v32  ;;  %v494_v16 = vadd.f32 %v493_v11, %v1429_v32  ;;  %334 = vadd.xlane.f32.xlu0 %v333_v8  ;;  %507 = vadd.xlane.f32.xlu2 %v506_v9  ;;  %v68_v32 = vld [vmem:[%s1744_s6 + $0x10] sm:$0xff]  ;;  %v1553_v8 = vld [vmem:[%s1741_s3 + $0x8] sm:$0xff] }
  0xcd   :  { %v72_v33 = vmul.f32 0.999, %v68_v32  ;;  %v646_v4 = vpop.f32.mrf.mxu1  ;;  %557 = vmatpush.msra.mxu0 %v1553_v8  ;;  %v725_v32 = vsel %vm171_vm0, %v720_v26, 0 }
  0xce   :  { %v502_v21 = vmax.f32 %v475_v14, 0.0  ;;  %v503_v19 = vmax.f32 %v494_v16, 0.0  ;;  %v1560_v16 = vld [vmem:[%s1741_s3] sm:$0xff]  ;;  %s1033_s3 = sshll.u32 %s1747_s9, 4  ;;  %s1034_s3 = int_to_ptr.hbm [resolvable:$true] %s1033_s3 }
  0xcf   :  { %v84_v2 = vadd.f32 %v80_v29, %v72_v33  ;;  %558 = vmatpush.msra.mxu0 %v1560_v16 }
  0xd0   :  { %v512_v24 = vadd.f32 %v503_v19, %v502_v21 }
  0xd1   :  { %89 = vst.msk [vmem:[%s1750_s12 + $0x10] sm:$0xff] %vm86_vm2, %v84_v2  ;;  %753 = vmatpush.bf16.msrb.mxu0 %v725_v32 }
  0xd2   :  { %513 = vadd.xlane.f32.xlu1 %v512_v24 }
  0xd3   :  { %v476_v27 = vpop.f32.mrf.mxu2  ;;  %v495_v28 = vpop.f32.mrf.mxu3 }
  0xd4   :  { %v477_v31 = vadd.f32 %v476_v27, %v1444_v56  ;;  %v496_v23 = vadd.f32 %v495_v28, %v1444_v56  ;;  %510 = vadd.xlane.f32.xlu2 %v509_v25  ;;  %v588_v56 = vld [vmem:[%s1750_s12 + $0x18] sm:$0xff] }
  0xd5   :  { %v1562_v17 = vpop.f32.mrf.mxu1 }
  0xd6   :  { %v504_v34 = vmax.f32 %v477_v31, 0.0  ;;  %v505_v35 = vmax.f32 %v496_v23, 0.0 }
  0xd8   :  { %v515_v37 = vadd.f32 %v505_v35, %v504_v34  ;;  %v587_v39 = vld [vmem:[%s1750_s12 + $0x10] sm:$0xff] }
  0xda   :  { %425 = vadd.xlane.f32.xlu1 %v424_v36 }
  0xdb   :  { %v665_v6 = vpop.f32.mrf.mxu2 }
  0xdc   :  { %516 = vadd.xlane.f32.xlu2 %v515_v37 }
  0xdd   :  { %v651_v23 = vpop.f32.mrf.mxu1 }
  0xe0   :  { %607 = vperm.xlu0 %1117, %v585_v3  }
  0xe3   :  { %v1565_v18 = vpop.f32.mrf.mxu2 }
  0xe8   :  { %622 = vperm.xlu0 %1117, %v588_v56  }
  0xeb   :  { %v670_v34 = vpop.f32.mrf.mxu2 }
  0xf3   :  { %612 = vperm.xlu1 %1118, %v586_v38  }
  0xf4   :  { %617 = vperm.xlu2 %1119, %v587_v39  }
 0x107   :  { %v226_v40 = vpop.xlane.xlu2 %225 }
 0x108   :  { %v236_v49 = vmul.f32 0.00390625, %v226_v40 }
 0x10a   :  { %v246_v53 = vperm.slane %v236_v49, %v1520_v44  ;;  %v653_v49 = vpop.f32.mrf.mxu1 }
 0x10f   :  { %v229_v41 = vpop.xlane.xlu2 %228 }
 0x110   :  { %v237_v46 = vmul.f32 0.00390625, %v229_v41 }
 0x112   :  { %v248_v50 = vperm.slane %v237_v46, %v1523_v45 }
 0x114   :  { %v250_v58 = vsel %vm249_vm3, %v248_v50, %v246_v53  ;;  %v672_v53 = vpop.f32.mrf.mxu2 }
 0x115   :  { %v326_v0 = vpop.xlane.xlu0 %325 }
 0x116   :  { %v336_v7 = vmul.f32 0.00390625, %v326_v0 }
 0x117   :  { %v232_v43 = vpop.xlane.xlu2 %231 }
 0x118   :  { %v238_v48 = vmul.f32 0.00390625, %v232_v43  ;;  %v344_v24 = vperm.slane %v336_v7, %v1520_v44 }
 0x11a   :  { %v252_v51 = vperm.slane %v238_v48, %v1526_v47 }
 0x11c   :  { %v254_v60 = vsel %vm253_vm4, %v252_v51, %v250_v58 }
 0x11d   :  { %v329_v9 = vpop.xlane.xlu1 %328 }
 0x11e   :  { %v337_v13 = vmul.f32 0.00390625, %v329_v9 }
 0x11f   :  { %v235_v52 = vpop.xlane.xlu2 %234 }
 0x120   :  { %v239_v54 = vmul.f32 0.00390625, %v235_v52  ;;  %v345_v21 = vperm.slane %v337_v13, %v1523_v45 }
 0x122   :  { %v256_v59 = vperm.slane %v239_v54, %v1530_v12  ;;  %v346_v27 = vsel %vm249_vm3, %v345_v21, %v344_v24 }
 0x124   :  { %v258_v61 = vsel %vm257_vm5, %v256_v59, %v254_v60 }
 0x125   :  { %261 = vst.msk [vmem:[#allocation2] sm:$0x1] %vm260_vm6, %v258_v61 }
 0x127   :  { %v332_v62 = vpop.xlane.xlu2 %331 }
 0x128   :  { %v338_v14 = vmul.f32 0.00390625, %v332_v62 }
 0x12a   :  { %v347_v19 = vperm.slane %v338_v14, %v1526_v47 }
 0x12c   :  { %v348_v29 = vsel %vm253_vm4, %v347_v19, %v346_v27 }
 0x12f   :  { %v417_v1 = vpop.xlane.xlu2 %416 }
 0x130   :  { %v427_v2 = vmul.f32 0.00390625, %v417_v1 }
 0x132   :  { %v435_v56 = vperm.slane %v427_v2, %v1520_v44 }
 0x137   :  { %v423_v10 = vpop.xlane.xlu0 %422  ;;  %v420_v11 = vpop.xlane.xlu2 %419 }
 0x138   :  { %v428_v33 = vmul.f32 0.00390625, %v420_v11  ;;  %v429_v36 = vmul.f32 0.00390625, %v423_v10  ;;  %v896_v10 = vld.sshfl [vmem:[#allocation1 + $0x8] sm:$0xff pattern:$0x75316420] }
 0x139   :  { %v900_v21 = vpack.c.bf16 %v896_v10, %v896_v10 }
 0x13a   :  { %v436_v37 = vperm.slane %v428_v33, %v1523_v45  ;;  %v438_v39 = vperm.slane %v429_v36, %v1526_v47 }
 0x13b   :  { %v905_v27 = vsel %vm171_vm0, %v900_v21, 0 }
 0x13c   :  { %v437_v42 = vsel %vm249_vm3, %v436_v37, %v435_v56 }
 0x13d   :  { %v439_v58 = vsel %vm253_vm4, %v438_v39, %v437_v42 }
 0x13f   :  { %v335_v20 = vpop.xlane.xlu0 %334  ;;  %v508_v22 = vpop.xlane.xlu2 %507 }
 0x140   :  { %v339_v25 = vmul.f32 0.00390625, %v335_v20  ;;  %v518_v3 = vmul.f32 0.00390625, %v508_v22  ;;  %v826_v22 = vpop.f32.mrf.mxu1 }
 0x142   :  { %v349_v28 = vperm.slane %v339_v25, %v1530_v12  ;;  %v526_v43 = vperm.slane %v518_v3, %v1520_v44  ;;  %v845_v25 = vpop.f32.mrf.mxu2 }
 0x144   :  { %v350_v30 = vsel %vm257_vm5, %v349_v28, %v348_v29 }
 0x145   :  { %352 = vst.msk [vmem:[#allocation2 + $0x1] sm:$0x1] %vm260_vm6, %v350_v30  ;;  %v514_v31 = vpop.xlane.xlu1 %513 }
 0x146   :  { %v520_v40 = vmul.f32 0.00390625, %v514_v31 }
 0x147   :  { %v511_v35 = vpop.xlane.xlu2 %510 }
 0x148   :  { %v519_v55 = vmul.f32 0.00390625, %v511_v35  ;;  %v529_v54 = vperm.slane %v520_v40, %v1526_v47  ;;  %v828_v33 = vpop.f32.mrf.mxu1 }
 0x14a   :  { %v527_v38 = vperm.slane %v519_v55, %v1523_v45 }
 0x14c   :  { %v528_v50 = vsel %vm249_vm3, %v527_v38, %v526_v43 }
 0x14d   :  { %v426_v41 = vpop.xlane.xlu1 %425  ;;  %v530_v62 = vsel %vm253_vm4, %v529_v54, %v528_v50 }
 0x14e   :  { %v430_v46 = vmul.f32 0.00390625, %v426_v41 }
 0x14f   :  { %v517_v48 = vpop.xlane.xlu2 %516 }
 0x150   :  { %v440_v51 = vperm.slane %v430_v46, %v1530_v12  ;;  %v521_v52 = vmul.f32 0.00390625, %v517_v48 }
 0x152   :  { %v441_v59 = vsel %vm257_vm5, %v440_v51, %v439_v58  ;;  %v531_v60 = vperm.slane %v521_v52, %v1530_v12  ;;  %v1590_v61 = vpop.permute.xlu0 %607  ;;  %v736_v58 = vpop.f32.mrf.mxu3 }
 0x153   :  { %443 = vst.msk [vmem:[#allocation2 + $0x2] sm:$0x1] %vm260_vm6, %v441_v59  ;;  %v647_v0 = vadd.f32 %v646_v4, %v1590_v61  ;;  %v666_v1 = vadd.f32 %v665_v6, %v1590_v61  ;;  %v827_v42 = vadd.f32 %v826_v22, %v1590_v61  ;;  %v846_v43 = vadd.f32 %v845_v25, %v1590_v61 }
 0x154   :  { %v532_v9 = vsel %vm257_vm5, %v531_v60, %v530_v62 }
 0x155   :  { %534 = vst.msk [vmem:[#allocation2 + $0x3] sm:$0x1] %vm260_vm6, %v532_v9  ;;  %v675_v11 = vmax.f32 %v647_v0, 0.0  ;;  %v676_v13 = vmax.f32 %v666_v1, 0.0  ;;  %v855_v46 = vmax.f32 %v827_v42, 0.0  ;;  %v856_v48 = vmax.f32 %v846_v43, 0.0 }
 0x157   :  { %v683_v14 = vadd.f32 %v676_v13, %v675_v11  ;;  %v1598_v7 = vpop.permute.xlu2 %617  ;;  %v863_v51 = vadd.f32 %v856_v48, %v855_v46 }
 0x158   :  { %v652_v19 = vadd.f32 %v651_v23, %v1598_v7  ;;  %v671_v20 = vadd.f32 %v670_v34, %v1598_v7  ;;  %v847_v34 = vpop.f32.mrf.mxu2 }
 0x159   :  { %684 = vadd.xlane.f32.xlu1 %v683_v14 }
 0x15a   :  { %v1602_v4 = vpop.permute.xlu0 %622  ;;  %v679_v6 = vmax.f32 %v652_v19, 0.0  ;;  %v680_v24 = vmax.f32 %v671_v20, 0.0  ;;  %v738_v60 = vpop.f32.mrf.mxu3  ;;  %v737_v19 = vadd.f32 %v736_v58, %v1590_v61 }
 0x15b   :  { %v654_v26 = vadd.f32 %v653_v49, %v1602_v4  ;;  %v673_v32 = vadd.f32 %v672_v53, %v1602_v4  ;;  %v831_v49 = vpop.f32.mrf.mxu1 }
 0x15c   :  { %v535_v28 = vld [vmem:[#allocation2] sm:$0xf]  ;;  %v689_v29 = vadd.f32 %v680_v24, %v679_v6 }
 0x15d   :  { %1093 = vmatmul.msk.f32.vlgmr.msra.gmra.mxu0 %vm539_vm7, %v535_v28  ;;  %v681_v30 = vmax.f32 %v654_v26, 0.0  ;;  %v682_v31 = vmax.f32 %v673_v32, 0.0  ;;  %v765_v28 = vmax.f32 %v737_v19, 0.0 }
 0x15e   :  { %690 = vadd.xlane.f32.xlu2 %v689_v29  ;;  %933 = vmatpush.bf16.msra.mxu0 %v905_v27 }
 0x15f   :  { %v692_v23 = vadd.f32 %v682_v31, %v681_v30 }
 0x160   :  { %v850_v50 = vpop.f32.mrf.mxu2 }
 0x161   :  { %693 = vadd.xlane.f32.xlu1 %v692_v23 }
 0x162   :  { %v741_v6 = vpop.f32.mrf.mxu3 }
 0x165   :  { %v1608_v35 = vpop.permute.xlu1 %612  ;;  %1101 = vmatmul.msk.bf16.vlgmr.msrb.gmra.mxu0 %vm61_vm1, %v1380_v57 }
 0x166   :  { %v829_v2 = vadd.f32 %v828_v33, %v1608_v35  ;;  %v848_v55 = vadd.f32 %v847_v34, %v1608_v35  ;;  %v649_v36 = vadd.f32 %v1562_v17, %v1608_v35  ;;  %v668_v37 = vadd.f32 %v1565_v18, %v1608_v35 }
 0x167   :  { %v832_v17 = vadd.f32 %v831_v49, %v1598_v7  ;;  %v851_v18 = vadd.f32 %v850_v50, %v1598_v7  ;;  %v739_v30 = vadd.f32 %v738_v60, %v1608_v35 }
 0x168   :  { %v857_v3 = vmax.f32 %v829_v2, 0.0  ;;  %v858_v56 = vmax.f32 %v848_v55, 0.0  ;;  %v677_v38 = vmax.f32 %v649_v36, 0.0  ;;  %v678_v39 = vmax.f32 %v668_v37, 0.0 }
 0x169   :  { %v859_v52 = vmax.f32 %v832_v17, 0.0  ;;  %v860_v53 = vmax.f32 %v851_v18, 0.0  ;;  %v767_v34 = vmax.f32 %v739_v30, 0.0  ;;  %v742_v36 = vadd.f32 %v741_v6, %v1598_v7 }
 0x16a   :  { %v866_v40 = vadd.f32 %v858_v56, %v857_v3  ;;  %v686_v41 = vadd.f32 %v678_v39, %v677_v38  ;;  %v743_v2 = vpop.f32.mrf.mxu3 }
 0x16b   :  { %v869_v54 = vadd.f32 %v860_v53, %v859_v52  ;;  %v769_v56 = vmax.f32 %v742_v36, 0.0 }
 0x16c   :  { %867 = vadd.xlane.f32.xlu2 %v866_v40  ;;  %687 = vadd.xlane.f32.xlu0 %v686_v41 }
 0x172   :  { %v916_v40 = vpop.f32.mrf.mxu3 }
 0x173   :  { %v917_v42 = vadd.f32 %v916_v40, %v1590_v61 }
 0x174   :  { %864 = vadd.xlane.f32.xlu0 %v863_v51 }
 0x175   :  { %1102 = vmatmul.msk.bf16.gmra.mxu0 %vm61_vm1, %v1416_v15  ;;  %v945_v50 = vmax.f32 %v917_v42, 0.0  ;;  %v104_v42 = vmul.f32 0.001, %v1553_v8 }
 0x17a   :  { %v918_v43 = vpop.f32.mrf.mxu3 }
 0x17b   :  { %v919_v18 = vadd.f32 %v918_v43, %v1608_v35 }
 0x17c   :  { %870 = vadd.xlane.f32.xlu0 %v869_v54 }
 0x17d   :  { %v947_v58 = vmax.f32 %v919_v18, 0.0 }
 0x182   :  { %v921_v53 = vpop.f32.mrf.mxu3 }
 0x185   :  { %1111 = vmatmul.msk.bf16.vlgmr.msra.gmra.mxu0 %vm61_vm1, %v1380_v57 }
 0x195   :  { %1112 = vmatmul.msk.bf16.gmra.mxu0 %vm61_vm1, %v1416_v15 }
 0x1cc   :  { %v685_v59 = vpop.xlane.xlu1 %684 }
 0x1cd   :  { %v695_v10 = vmul.f32 0.00390625, %v685_v59 }
 0x1cf   :  { %v703_v57 = vperm.slane %v695_v10, %v1520_v44 }
 0x1d1   :  { %v691_v0 = vpop.xlane.xlu2 %690 }
 0x1d2   :  { %v697_v9 = vmul.f32 0.00390625, %v691_v0  ;;  %v922_v0 = vadd.f32 %v921_v53, %v1598_v7 }
 0x1d4   :  { %v694_v1 = vpop.xlane.xlu1 %693  ;;  %v706_v21 = vperm.slane %v697_v9, %v1526_v47 }
 0x1d5   :  { %v698_v13 = vmul.f32 0.00390625, %v694_v1 }
 0x1d7   :  { %v708_v24 = vperm.slane %v698_v13, %v1530_v12  ;;  %v852_v13 = vpop.f32.mrf.mxu2 }
 0x1da   :  { %v1628_v62 = vpop.f32.mrf.mxu0 }
 0x1df   :  { %v688_v11 = vpop.xlane.xlu0 %687 }
 0x1e0   :  { %v696_v14 = vmul.f32 0.00390625, %v688_v11  ;;  %v833_v11 = vpop.f32.mrf.mxu1 }
 0x1e2   :  { %v704_v15 = vperm.slane %v696_v14, %v1523_v45  ;;  %v755_v20 = vpop.f32.mrf.mxu0 }
 0x1e3   :  { %v756_v22 = vadd.f32 %v755_v20, %v1590_v61  ;;  %v853_v20 = vadd.f32 %v852_v13, %v1602_v4 }
 0x1e4   :  { %v705_v25 = vsel %vm249_vm3, %v704_v15, %v703_v57  ;;  %v923_v57 = vpop.f32.mrf.mxu3  ;;  %v834_v15 = vadd.f32 %v833_v11, %v1602_v4 }
 0x1e5   :  { %v707_v26 = vsel %vm253_vm4, %v706_v21, %v705_v25  ;;  %v766_v27 = vmax.f32 %v756_v22, 0.0  ;;  %v949_v21 = vmax.f32 %v922_v0, 0.0 }
 0x1e6   :  { %v709_v32 = vsel %vm257_vm5, %v708_v24, %v707_v26  ;;  %v861_v26 = vmax.f32 %v834_v15, 0.0 }
 0x1e7   :  { %711 = vst.msk [vmem:[#allocation3] sm:$0x1] %vm260_vm6, %v709_v32  ;;  %v773_v29 = vadd.f32 %v766_v27, %v765_v28  ;;  %v862_v27 = vmax.f32 %v853_v20, 0.0 }
 0x1e9   :  { %774 = vadd.xlane.f32.xlu2 %v773_v29 }
 0x1ea   :  { %v757_v31 = vpop.f32.mrf.mxu0 }
 0x1eb   :  { %v758_v23 = vadd.f32 %v757_v31, %v1608_v35  ;;  %v872_v31 = vadd.f32 %v862_v27, %v861_v26 }
 0x1ed   :  { %v768_v33 = vmax.f32 %v758_v23, 0.0 }
 0x1ef   :  { %v776_v55 = vadd.f32 %v768_v33, %v767_v34  ;;  %v865_v33 = vpop.xlane.xlu0 %864  ;;  %v94_v34 = vld [vmem:[%s1745_s7 + $0x18] sm:$0xff] }
 0x1f0   :  { %v875_v13 = vmul.f32 0.00390625, %v865_v33 }
 0x1f1   :  { %777 = vadd.xlane.f32.xlu1 %v776_v55 }
 0x1f2   :  { %v760_v37 = vpop.f32.mrf.mxu0 }
 0x1f3   :  { %v761_v3 = vadd.f32 %v760_v37, %v1598_v7 }
 0x1f5   :  { %v770_v38 = vmax.f32 %v761_v3, 0.0  ;;  %v105_v3 = vmul.f32 0.001, %v1548_v5 }
 0x1f7   :  { %v779_v39 = vadd.f32 %v770_v38, %v769_v56 }
 0x1f9   :  { %780 = vadd.xlane.f32.xlu1 %v779_v39  ;;  %v871_v39 = vpop.xlane.xlu0 %870 }
 0x1fa   :  { %v762_v41 = vpop.f32.mrf.mxu0 }
 0x1fb   :  { %v763_v59 = vadd.f32 %v762_v41, %v1602_v4 }
 0x1fd   :  { %v772_v9 = vmax.f32 %v763_v59, 0.0 }
 0x202   :  { %v935_v46 = vpop.f32.mrf.mxu0 }
 0x203   :  { %v936_v48 = vadd.f32 %v935_v46, %v1590_v61  ;;  %v744_v61 = vadd.f32 %v743_v2, %v1602_v4  ;;  %v98_v2 = vmul.f32 0.999, %v94_v34 }
 0x205   :  { %v946_v49 = vmax.f32 %v936_v48, 0.0  ;;  %v771_v19 = vmax.f32 %v744_v61, 0.0  ;;  %v103_v48 = vmul.f32 0.001, %v1560_v16  ;;  %v117_v16 = vld [vmem:[%s1742_s4] sm:$0x1] }
 0x207   :  { %v953_v17 = vadd.f32 %v946_v49, %v945_v50  ;;  %v782_v6 = vadd.f32 %v772_v9, %v771_v19 }
 0x209   :  { %954 = vadd.xlane.f32.xlu1 %v953_v17  ;;  %v115_v17 = vld [vmem:[%s1746_s8] sm:$0x1] }
 0x20a   :  { %v937_v51 = vpop.f32.mrf.mxu0 }
 0x20b   :  { %v938_v52 = vadd.f32 %v937_v51, %v1608_v35  ;;  %v1120_v35 = vld [vmem:[%s1742_s4] ss:$0 sm:$0xff]  ;;  %v116_v51 = vmul.f32 0.999, %v115_v17 }
 0x20c   :  { %v1658_v24 = vadd.f32 %v1120_v35, %v1628_v62 }
 0x20d   :  { %v948_v54 = vmax.f32 %v938_v52, 0.0  ;;  %v118_v52 = vmul.f32 0.001, %v117_v16 }
 0x20e   :  { %v563_v32 = vmul.f32 %v1658_v24, %v1658_v24 }
 0x20f   :  { %v956_v60 = vadd.f32 %v948_v54, %v947_v58  ;;  %v119_v54 = vadd.f32 %v118_v52, %v116_v51 }
 0x210   :  { %v565_v62 = vsel %vm564_vm8, %v563_v32, 0.0 }
 0x211   :  { %957 = vadd.xlane.f32.xlu0 %v956_v60  ;;  %120 = vst [vmem:[%s1752_s14] sm:$0x1] %v119_v54 }
 0x212   :  { %v940_v1 = vpop.f32.mrf.mxu0 }
 0x213   :  { %v941_v10 = vadd.f32 %v940_v1, %v1598_v7  ;;  %v924_v7 = vadd.f32 %v923_v57, %v1602_v4 }
 0x215   :  { %v950_v14 = vmax.f32 %v941_v10, 0.0  ;;  %v951_v29 = vmax.f32 %v924_v7, 0.0  ;;  %v883_v7 = vperm.slane %v875_v13, %v1520_v44 }
 0x217   :  { %v959_v22 = vadd.f32 %v950_v14, %v949_v21  ;;  %v877_v21 = vmul.f32 0.00390625, %v871_v39 }
 0x219   :  { %960 = vadd.xlane.f32.xlu2 %v959_v22  ;;  %783 = vadd.xlane.f32.xlu0 %v782_v6 }
 0x21a   :  { %v942_v25 = vpop.f32.mrf.mxu0 }
 0x21b   :  { %v943_v28 = vadd.f32 %v942_v25, %v1602_v4  ;;  %v106_v4 = vmul.f32 0.001, %v1542_v63  ;;  %v868_v63 = vpop.xlane.xlu2 %867  ;;  %v886_v25 = vperm.slane %v877_v21, %v1526_v47 }
 0x21c   :  { %v876_v15 = vmul.f32 0.00390625, %v868_v63 }
 0x21d   :  { %v952_v30 = vmax.f32 %v943_v28, 0.0  ;;  %v110_v55 = vadd.f32 %v106_v4, %v98_v2 }
 0x21e   :  { %v884_v32 = vperm.slane %v876_v15, %v1523_v45 }
 0x21f   :  { %v962_v23 = vadd.f32 %v952_v30, %v951_v29  ;;  %114 = vst [vmem:[%s1751_s13 + $0x18] sm:$0xff] %v110_v55  ;;  %1001 = vmatpush.msra.mxu1 %v110_v55 }
 0x220   :  { %v885_v34 = vsel %vm249_vm3, %v884_v32, %v883_v7 }
 0x221   :  { %873 = vadd.xlane.f32.xlu2 %v872_v31  ;;  %566 = vadd.xlane.f32.xlu0 %v565_v62  ;;  %v887_v2 = vsel %vm253_vm4, %v886_v25, %v885_v34 }
 0x222   :  { %963 = vadd.xlane.f32.xlu1 %v962_v23 }
 0x226   :  { %v93_v36 = vld [vmem:[%s1745_s7 + $0x10] sm:$0xff]  ;;  %v92_v38 = vld [vmem:[%s1745_s7 + $0x8] sm:$0xff]  ;;  %v91_v43 = vld [vmem:[%s1745_s7] sm:$0xff] }
 0x227   :  { %v97_v37 = vmul.f32 0.999, %v93_v36  ;;  %v96_v41 = vmul.f32 0.999, %v92_v38  ;;  %v95_v46 = vmul.f32 0.999, %v91_v43 }
 0x229   :  { %v109_v40 = vadd.f32 %v105_v3, %v97_v37  ;;  %v108_v5 = vadd.f32 %v104_v42, %v96_v41  ;;  %v107_v49 = vadd.f32 %v103_v48, %v95_v46  ;;  %v1121_v42 = vld [vmem:[%s1752_s14] ss:$0 sm:$0xff]  ;;  %s1180_s14 = smov [#allocation6]  }
 0x22a   :  { %s1042_s15 = sshll.u32 %s1180_s14, 4  ;;  %s1043_s15 = int_to_ptr.vmem [resolvable:$true] %s1042_s15 }
 0x22b   :  { %113 = vst [vmem:[%s1751_s13 + $0x10] sm:$0xff] %v109_v40  ;;  %1002 = vmatpush.msra.mxu1 %v109_v40 }
 0x22c   :  { %112 = vst [vmem:[%s1751_s13 + $0x8] sm:$0xff] %v108_v5 }
 0x22d   :  { %1003 = vmatpush.msra.mxu1 %v108_v5  ;;  %111 = vst [vmem:[%s1751_s13] sm:$0xff] %v107_v49 }
 0x22f   :  { %1004 = vmatpush.msra.mxu1 %v107_v49 }
 0x25c   :  { %v775_v8 = vpop.xlane.xlu2 %774 }
 0x25d   :  { %v785_v59 = vmul.f32 0.00390625, %v775_v8 }
 0x25f   :  { %v793_v9 = vperm.slane %v785_v59, %v1520_v44 }
 0x264   :  { %v778_v56 = vpop.xlane.xlu1 %777 }
 0x265   :  { %v786_v53 = vmul.f32 0.00390625, %v778_v56 }
 0x267   :  { %v794_v60 = vperm.slane %v786_v53, %v1523_v45 }
 0x269   :  { %v795_v35 = vsel %vm249_vm3, %v794_v60, %v793_v9 }
 0x26c   :  { %v781_v18 = vpop.xlane.xlu1 %780 }
 0x26d   :  { %v787_v58 = vmul.f32 0.00390625, %v781_v18 }
 0x26f   :  { %v796_v0 = vperm.slane %v787_v58, %v1526_v47 }
 0x271   :  { %v797_v19 = vsel %vm253_vm4, %v796_v0, %v795_v35 }
 0x27c   :  { %v955_v10 = vpop.xlane.xlu1 %954 }
 0x27d   :  { %v965_v6 = vmul.f32 0.00390625, %v955_v10 }
 0x27f   :  { %v973_v62 = vperm.slane %v965_v6, %v1520_v44 }
 0x284   :  { %v958_v50 = vpop.xlane.xlu0 %957 }
 0x285   :  { %v966_v57 = vmul.f32 0.00390625, %v958_v50 }
 0x287   :  { %v974_v26 = vperm.slane %v966_v57, %v1523_v45 }
 0x289   :  { %v975_v55 = vsel %vm249_vm3, %v974_v26, %v973_v62 }
 0x28c   :  { %v961_v61 = vpop.xlane.xlu2 %960  ;;  %v784_v1 = vpop.xlane.xlu0 %783 }
 0x28d   :  { %v788_v11 = vmul.f32 0.00390625, %v784_v1  ;;  %v967_v20 = vmul.f32 0.00390625, %v961_v61 }
 0x28f   :  { %v798_v14 = vperm.slane %v788_v11, %v1530_v12  ;;  %v976_v29 = vperm.slane %v967_v20, %v1526_v47 }
 0x291   :  { %v799_v22 = vsel %vm257_vm5, %v798_v14, %v797_v19  ;;  %v977_v45 = vsel %vm253_vm4, %v976_v29, %v975_v55 }
 0x292   :  { %801 = vst.msk [vmem:[#allocation3 + $0x1] sm:$0x1] %vm260_vm6, %v799_v22 }
 0x294   :  { %v874_v27 = vpop.xlane.xlu2 %873  ;;  %v567_v28 = vpop.xlane.xlu0 %566 }
 0x295   :  { %v878_v30 = vmul.f32 0.00390625, %v874_v27  ;;  %v568_v31 = vmax.f32 %v567_v28, 1e-24  ;;  %v964_v23 = vpop.xlane.xlu1 %963 }
 0x296   :  { %v968_v33 = vmul.f32 0.00390625, %v964_v23 }
 0x297   :  { %v888_v4 = vperm.slane %v878_v30, %v1530_v12  ;;  %1122 = vrsqrt.f32 %v568_v31  ;;  %vm575_vm10 = vweird.f32 %v568_v31 }
 0x298   :  { %v978_v36 = vperm.slane %v968_v33, %v1530_v12 }
 0x299   :  { %v889_v47 = vsel %vm257_vm5, %v888_v4, %v887_v2 }
 0x29a   :  { %891 = vst.msk [vmem:[#allocation3 + $0x2] sm:$0x1] %vm260_vm6, %v889_v47  ;;  %v979_v44 = vsel %vm257_vm5, %v978_v36, %v977_v45 }
 0x29b   :  { %981 = vst.msk [vmem:[#allocation3 + $0x3] sm:$0x1] %vm260_vm6, %v979_v44 }
 0x29d   :  { %v1123_v37 = vpop.eup %1122 }
 0x29e   :  { %v570_v3 = vmul.f32 %v1123_v37, %v568_v31  ;;  %vm576_vm9 = vweird.f32 %v1123_v37 }
 0x29f   :  { %vm577_vm11 = vmor %vm575_vm10, %vm576_vm9 }
 0x2a0   :  { %v571_v56 = vmul.f32 %v1123_v37, %v570_v3 }
 0x2a2   :  { %v572_v38 = vmul.f32 0.5, %v571_v56  ;;  %v982_v63 = vld [vmem:[#allocation3] sm:$0xf] }
 0x2a3   :  { %1113 = vmatmul.msk.f32.vlgmr.msra.gmra.mxu1 %vm539_vm7, %v982_v63 }
 0x2a4   :  { %v573_v39 = vsub.f32 1.5, %v572_v38 }
 0x2a6   :  { %v574_v12 = vmul.f32 %v1123_v37, %v573_v39 }
 0x2a8   :  { %v578_v40 = vsel %vm577_vm11, %v1123_v37, %v574_v12 }
 0x2a9   :  { %v579_v41 = vmul.f32 %v578_v40, %v1658_v24 }
 0x2ab   :  { %580 = vst [vmem:[#allocation4] sm:$0xf] %v579_v41 }
 0x2ac   :  { %1036 = dma.vmem_to_hbm [thread:$0]  %s1032_s2, 64, %s1034_s3, [#allocation5]  }
 0x320   :  { %v1006_v43 = vpop.f32.mrf.mxu1 }
 0x321   :  { %v1007_v5 = vadd.f32 %v1121_v42, %v1006_v43 }
 0x323   :  { %v1009_v46 = vmul.f32 %v1007_v5, %v1007_v5 }
 0x325   :  { %v1010_v48 = vsel %vm564_vm8, %v1009_v46, 0.0 }
 0x326   :  { %1011 = vadd.xlane.f32.xlu2 %v1010_v48 }
 0x399   :  { %v1012_v24 = vpop.xlane.xlu2 %1011 }
 0x39a   :  { %v1013_v49 = vmax.f32 %v1012_v24, 1e-24 }
 0x39c   :  { %1124 = vrsqrt.f32 %v1013_v49  ;;  %vm1020_vm13 = vweird.f32 %v1013_v49 }
 0x3a2   :  { %v1125_v8 = vpop.eup %1124 }
 0x3a3   :  { %v1015_v50 = vmul.f32 %v1125_v8, %v1013_v49  ;;  %vm1021_vm12 = vweird.f32 %v1125_v8 }
 0x3a4   :  { %vm1022_vm14 = vmor %vm1020_vm13, %vm1021_vm12 }
 0x3a5   :  { %v1016_v17 = vmul.f32 %v1125_v8, %v1015_v50 }
 0x3a7   :  { %v1017_v16 = vmul.f32 0.5, %v1016_v17 }
 0x3a9   :  { %v1018_v18 = vsub.f32 1.5, %v1017_v16 }
 0x3ab   :  { %v1019_v51 = vmul.f32 %v1125_v8, %v1018_v18 }
 0x3ad   :  { %v1023_v52 = vsel %vm1022_vm14, %v1125_v8, %v1019_v51 }
 0x3ae   :  { %v1024_v53 = vmul.f32 %v1023_v52, %v1007_v5 }
 0x3b0   :  { %1025 = vst [vmem:[#allocation6] sm:$0xf] %v1024_v53 }
 0x3b1   :  { %1047 = dma.vmem_to_hbm [thread:$0]  %s1043_s15, 64, %s1045_s5, [#allocation7]  }
 0x3b2   :  { %1174 = dma.done.wait [#allocation5], 64  }
 0x3b3   :  { %1175 = vsyncadd [#allocation5], 4294967232 }
 0x3b4   :  { %1176 = dma.done.wait [#allocation7], 64  }
 0x3b5   :  { %1177 = vsyncadd [#allocation7], 4294967232 }
 0x3b6   :  { %1072 = vsyncpa [#allocation5], 1 }
 0x3b7   :  { %1073 = vsyncpa [#allocation7], 1 }

</bundles_post_ra>
